<compile_context>
chip_gen: v7x
topology: tpu7x:2x2x1
jax: 0.10.0
libtpu: 0.0.40
codegen_flags: <defaults>
</compile_context>

<pallas_src>
import numpy as np
import jax
import jax.numpy as jnp
from jax import lax
from jax.experimental import pallas as pl
from jax.experimental.pallas import tpu as pltpu

RE_EPS = 1e-4          # ReEig rectification threshold (torchspdnet default)
DTYPE = jnp.float32


# --------------------------- Pallas kernels ---------------------------------

def _bimap_kernel(x_ref, wt_ref, o_ref):
    """P[b, co] = sum_ci W[co,ci]^T @ X[b,ci] @ W[co,ci]  with Wt = W^T pre-transposed.
    x_ref: (1, hi, ni, ni), wt_ref: (ho, hi, no, ni), o_ref: (1, ho, no, no)."""
    ho, hi, no, ni = wt_ref.shape
    for co in range(ho):                                   # static ints -> unrolled
        acc = jnp.zeros((no, no), jnp.float32)
        for ci in range(hi):
            x = x_ref[0, ci]                               # (ni, ni)  symmetric
            wt = wt_ref[co, ci]                            # (no, ni)  = W^T
            t = jnp.dot(wt, x, preferred_element_type=jnp.float32)        # W^T X
            # (W^T X) @ W  ==  t @ wt^T  (A @ B^T form, MXU friendly)
            acc = acc + lax.dot_general(t, wt, (((1,), (1,)), ((), ())),
                                        preferred_element_type=jnp.float32)
        o_ref[0, co] = acc.astype(o_ref.dtype)


def _reeig_bimap_kernel(u_ref, s_ref, wt_ref, o_ref):
    """Fused ReEig reconstruction + next BiMap.
    P[b,co] = sum_ci W^T (U max(S,eps) U^T) W = M diag(max(s,eps)) M^T with M = W^T U.
    u_ref: (1, hi, n, n), s_ref: (1, hi, 1, n), wt_ref: (ho, hi, no, n),
    o_ref: (1, ho, no, no)."""
    ho, hi, no, n = wt_ref.shape
    for co in range(ho):
        acc = jnp.zeros((no, no), jnp.float32)
        for ci in range(hi):
            u = u_ref[0, ci]                               # (n, n) eigenvectors (columns)
            fs = jnp.maximum(s_ref[0, ci], RE_EPS)         # (1, n) rectified eigenvalues
            wt = wt_ref[co, ci]                            # (no, n) = W^T
            m = jnp.dot(wt, u, preferred_element_type=jnp.float32)        # (no, n) = W^T U
            # (M * fs) @ M^T  (A @ B^T form)
            acc = acc + lax.dot_general(m * fs, m, (((1,), (1,)), ((), ())),
                                        preferred_element_type=jnp.float32)
        o_ref[0, co] = acc.astype(o_ref.dtype)


def _logeig_linear_kernel(u_ref, s_ref, lw_ref, o_ref):
    """Fused (ReEig o LogEig) reconstruction + Flatten + Linear (bias=False).
    y[b,c] = sum_{h,i,j} (U diag(log(max(s,eps))) U^T)[h,i,j] * lin_W[c,h,i,j].
    u_ref: (1, h, n, n), s_ref: (1, h, 1, n), lw_ref: (C, h, n, n), o_ref: (1, C, 1)."""
    C, h, n, _ = lw_ref.shape
    lw_all = lw_ref[...]                                   # (C, h, n, n) hoisted load
    acc = jnp.zeros((C, 1), jnp.float32)
    for ch in range(h):
        u = u_ref[0, ch]                                   # (n, n)
        ls = jnp.log(jnp.maximum(s_ref[0, ch], RE_EPS))    # (1, n)  clamped log eigenvalues
        x3 = lax.dot_general(u * ls, u, (((1,), (1,)), ((), ())),
                             preferred_element_type=jnp.float32)          # (n, n)
        lw = lw_all[:, ch]                                 # (C, n, n)
        prod = x3[None, :, :] * lw                         # (C, n, n)
        red = jnp.sum(prod, axis=-1)                       # (C, n)
        acc = acc + jnp.sum(red, axis=-1, keepdims=True)   # (C, 1)
    o_ref[0] = acc.astype(o_ref.dtype)


# --------------------------- pallas_call wrappers ----------------------------

def bimap_batched(X, Wt):
    """X: (B, hi, ni, ni), Wt: (ho, hi, no, ni) -> (B, ho, no, no)."""
    B, hi, ni, _ = X.shape
    ho, _, no, _ = Wt.shape
    return pl.pallas_call(
        _bimap_kernel,
        out_shape=jax.ShapeDtypeStruct((B, ho, no, no), DTYPE),
        grid=(B,),
        in_specs=[
            pl.BlockSpec((1, hi, ni, ni), lambda b: (b, 0, 0, 0)),
            pl.BlockSpec((ho, hi, no, ni), lambda b: (0, 0, 0, 0)),
        ],
        out_specs=pl.BlockSpec((1, ho, no, no), lambda b: (b, 0, 0, 0)),
        compiler_params=pltpu.CompilerParams(dimension_semantics=("parallel",)),
    )(X, Wt)


def reeig_bimap_fused(U, S, Wt):
    """U: (B, hi, n, n), S: (B, hi, 1, n), Wt: (ho, hi, no, n) -> (B, ho, no, no)."""
    B, hi, n, _ = U.shape
    ho, _, no, _ = Wt.shape
    return pl.pallas_call(
        _reeig_bimap_kernel,
        out_shape=jax.ShapeDtypeStruct((B, ho, no, no), DTYPE),
        grid=(B,),
        in_specs=[
            pl.BlockSpec((1, hi, n, n), lambda b: (b, 0, 0, 0)),
            pl.BlockSpec((1, hi, 1, n), lambda b: (b, 0, 0, 0)),
            pl.BlockSpec((ho, hi, no, n), lambda b: (0, 0, 0, 0)),
        ],
        out_specs=pl.BlockSpec((1, ho, no, no), lambda b: (b, 0, 0, 0)),
        compiler_params=pltpu.CompilerParams(dimension_semantics=("parallel",)),
    )(U, S, Wt)


def logeig_linear_fused(U, S, LW4):
    """U: (B, h, n, n), S: (B, h, 1, n), LW4: (C, h, n, n) -> logits (B, C)."""
    B, h, n, _ = U.shape
    C = LW4.shape[0]
    out = pl.pallas_call(
        _logeig_linear_kernel,
        out_shape=jax.ShapeDtypeStruct((B, C, 1), DTYPE),
        grid=(B,),
        in_specs=[
            pl.BlockSpec((1, h, n, n), lambda b: (b, 0, 0, 0)),
            pl.BlockSpec((1, h, 1, n), lambda b: (b, 0, 0, 0)),
            pl.BlockSpec((C, h, n, n), lambda b: (0, 0, 0, 0)),
        ],
        out_specs=pl.BlockSpec((1, C, 1), lambda b: (b, 0, 0)),
        compiler_params=pltpu.CompilerParams(dimension_semantics=("parallel",)),
    )(U, S, LW4)
    return out[:, :, 0]


# --------------------------- eigendecomposition ------------------------------

def _eigh_channels(P):
    """P: (B, h, n, n) -> eigenvectors (B, h, n, n), eigenvalues (B, h, 1, n).
    TODO(synk): symmetric eigendecomposition has no Pallas TPU primitive; it stays in
    jnp.linalg.eigh (which symmetrizes its input by default)."""
    B, h, n, _ = P.shape
    s, u = jnp.linalg.eigh(P.reshape(B * h, n, n))
    return (u.reshape(B, h, n, n).astype(DTYPE),
            s.reshape(B, h, 1, n).astype(DTYPE))


# --------------------------- parameter init (deterministic) ------------------

def _init_stiefel(rng, ho, hi, ni, no):
    """Mirrors functional.init_bimap_parameter: left singular vectors of v v^T."""
    W = np.zeros((ho, hi, ni, no), dtype=np.float64)
    for i in range(ho):
        for j in range(hi):
            v = rng.uniform(0.0, 1.0, size=(ni, ni))
            u_svd, _, _ = np.linalg.svd(v @ v.T)
            W[i, j] = u_svd[:, :no]
    return jnp.asarray(W, dtype=DTYPE)


def _init_xavier_uniform(rng, out_f, in_f):
    bound = np.sqrt(6.0 / (in_f + out_f))
    return jnp.asarray(rng.uniform(-bound, bound, size=(out_f, in_f)), dtype=DTYPE)


def build_params(n_classes=2, input_bimap_dim=32, bimap_dims=(28, 14),
                 channel_spd=1, seed=0):
    rng = np.random.default_rng(seed)
    bimaps_t = []
    input_dim = input_bimap_dim
    ch = channel_spd
    for output_dim in bimap_dims:
        ho = ch // 2 + 1
        w = _init_stiefel(rng, ho, ch, input_dim, output_dim)   # (ho, hi, ni, no)
        # pre-transpose once in the wrapper -> MXU-friendly in-kernel contractions
        bimaps_t.append(jnp.transpose(w, (0, 1, 3, 2)))         # (ho, hi, no, ni)
        input_dim = output_dim
        ch = ho
    lin_w = _init_xavier_uniform(rng, n_classes, bimap_dims[-1] ** 2 * ch)
    # reshape to (C, h, n, n) so the fused kernel matches nn.Flatten's row-major order
    lin_w4 = lin_w.reshape(n_classes, ch, bimap_dims[-1], bimap_dims[-1])
    return {"bimaps_t": bimaps_t, "lin_w4": lin_w4}


# --------------------------- forward (mirrors SPDNet_Module.forward) ---------

def spdnet_forward(x, params):
    if x.ndim < 4:
        x = x[:, None, :, :]
    p = x.astype(DTYPE)
    wts = params["bimaps_t"]
    p = bimap_batched(p, wts[0])                 # BiMap 1
    for wt in wts[1:]:
        u, s = _eigh_channels(p)                 # eigh of previous BiMap output
        p = reeig_bimap_fused(u, s, wt)          # ReEig (fused) + next BiMap
    u, s = _eigh_channels(p)                     # eigh of last BiMap output
    return logeig_linear_fused(u, s, params["lin_w4"])   # ReEig∘LogEig + Flatten + Linear


# --------------------------- pure-JAX reference (validation) -----------------

def _reference_forward(x, params):
    """Faithful (un-fused) replica of SPDNet_Module.forward in plain JAX/XLA, f32."""
    if x.ndim < 4:
        x = x[:, None, :, :]
    p = x.astype(DTYPE)

    def bimap(X, Wt):          # Wt[o,c,a,i] = W[o,c,i,a]
        return jnp.einsum("ocai,bcij,ocdj->boad", Wt, X, Wt)

    def spectral(P, fn):
        s, u = jnp.linalg.eigh(P)
        return jnp.einsum("...ik,...k,...jk->...ij", u, fn(s), u)

    for wt in params["bimaps_t"]:
        p = bimap(p, wt)                                    # BiMap
        p = spectral(p, lambda s: jnp.maximum(s, RE_EPS))   # ReEig
    p = spectral(p, jnp.log)                                # LogEig
    feat = p.reshape(p.shape[0], -1)                        # Flatten
    lw = params["lin_w4"].reshape(params["lin_w4"].shape[0], -1)
    return feat @ lw.T                                      # Linear (bias=False)


# --------------------------- demo --------------------------------------------

if __name__ == "__main__":
    key = jax.random.PRNGKey(0)
    B, C_SPD, N = 4, 1, 32                      # batch of SPD matrices of size 32x32
    a = jax.random.normal(key, (B, C_SPD, N, N), dtype=DTYPE)
    # well-conditioned SPD inputs: A A^T / N + I  (eigenvalues O(1))
    x = jnp.einsum("bcij,bckj->bcik", a, a) / N + jnp.eye(N, dtype=DTYPE)

    params = build_params(n_classes=2, input_bimap_dim=N,
                          bimap_dims=(28, 14), channel_spd=C_SPD, seed=0)

    y = jax.jit(lambda xx: spdnet_forward(xx, params))(x)
    jax.block_until_ready(y)

    y_ref = jax.jit(lambda xx: _reference_forward(xx, params))(x)
    jax.block_until_ready(y_ref)

    assert y.shape == (B, 2)
    assert bool(jnp.all(jnp.isfinite(y)))
    err = float(jnp.max(jnp.abs(y - y_ref)))
    scale = 1.0 + float(jnp.max(jnp.abs(y_ref)))
    assert err < 1e-2 * scale, f"mismatch vs. pure-JAX reference: {err}"
    print("KERNEL_OK")
</pallas_src>

<mosaic_0001>
module attributes {stable_mosaic.version = 11 : i64} {
  func.func @_bimap_kernel(%arg0: i32, %arg1: memref<1x1x32x32xf32, #tpu.memory_space<vmem>>, %arg2: memref<1x1x28x32xf32, #tpu.memory_space<vmem>>, %arg3: memref<1x1x28x28xf32, #tpu.memory_space<vmem>>) attributes {dimension_semantics = [#tpu.dimension_semantics<parallel>], iteration_bounds = array<i64: 4>, scalar_prefetch = 0 : i64, scratch_operands = 0 : i64, tpu.core_type = #tpu.core_type<tc>, window_params = [{transform_indices = @transform_0, window_bounds = array<i64: 1, 1, 32, 32>}, {pipeline_mode = #tpu.pipeline_mode<synchronous>, transform_indices = @transform_1, window_bounds = array<i64: 1, 1, 28, 32>}, {transform_indices = @transform_2, window_bounds = array<i64: 1, 1, 28, 28>}]} {
    %cst = arith.constant 0.000000e+00 : f32
    %0 = vector.broadcast %cst : f32 to vector<28x28xf32>
    %c0 = arith.constant 0 : index
    %c0_0 = arith.constant 0 : index
    %c0_1 = arith.constant 0 : index
    %c0_2 = arith.constant 0 : index
    %1 = vector.load %arg1[%c0, %c0_0, %c0_1, %c0_2] : memref<1x1x32x32xf32, #tpu.memory_space<vmem>>, vector<1x1x32x32xf32>
    %2 = vector.shape_cast %1 : vector<1x1x32x32xf32> to vector<32x32xf32>
    %c0_3 = arith.constant 0 : index
    %c0_4 = arith.constant 0 : index
    %c0_5 = arith.constant 0 : index
    %c0_6 = arith.constant 0 : index
    %3 = vector.load %arg2[%c0_3, %c0_4, %c0_5, %c0_6] : memref<1x1x28x32xf32, #tpu.memory_space<vmem>>, vector<1x1x28x32xf32>
    %4 = vector.shape_cast %3 : vector<1x1x28x32xf32> to vector<28x32xf32>
    %cst_7 = arith.constant dense<0.000000e+00> : vector<28x32xf32>
    %5 = tpu.matmul %4, %2, %cst_7 {dimension_numbers = #tpu.dot_dimension_numbers<[1], [0], [0], [1], [0, 0, 1, 1], [], []>} : vector<28x32xf32>, vector<32x32xf32>, vector<28x32xf32> -> vector<28x32xf32>
    %cst_8 = arith.constant dense<0.000000e+00> : vector<28x28xf32>
    %6 = tpu.matmul %5, %4, %cst_8 {dimension_numbers = #tpu.dot_dimension_numbers<[1], [1], [0], [0], [0, 0, 1, 0], [], []>} : vector<28x32xf32>, vector<28x32xf32>, vector<28x28xf32> -> vector<28x28xf32>
    %7 = arith.addf %0, %6 : vector<28x28xf32>
    %c0_9 = arith.constant 0 : index
    %c0_10 = arith.constant 0 : index
    %c0_11 = arith.constant 0 : index
    %c0_12 = arith.constant 0 : index
    %8 = vector.load %arg3[%c0_9, %c0_10, %c0_11, %c0_12] : memref<1x1x28x28xf32, #tpu.memory_space<vmem>>, vector<1x1x28x28xf32>
    %9 = vector.shape_cast %8 : vector<1x1x28x28xf32> to vector<28x28xf32>
    %10 = vector.shape_cast %7 : vector<28x28xf32> to vector<1x1x28x28xf32>
    tpu.vector_store %arg3[%c0_9, %c0_10, %c0_11, %c0_12], %10 {strides = array<i32>} : memref<1x1x28x28xf32, #tpu.memory_space<vmem>>, vector<1x1x28x28xf32>,
    return
  }
  func.func @transform_0(%arg0: i32) -> (i32, i32, i32, i32) {
    %c0_i32 = arith.constant 0 : i32
    %c0_i32_0 = arith.constant 0 : i32
    %c0_i32_1 = arith.constant 0 : i32
    %c0_i32_2 = arith.constant 0 : i32
    return %arg0, %c0_i32, %c0_i32_0, %c0_i32_1 : i32, i32, i32, i32
  }
  func.func @transform_1(%arg0: i32) -> (i32, i32, i32, i32) {
    %c0_i32 = arith.constant 0 : i32
    %c0_i32_0 = arith.constant 0 : i32
    %c0_i32_1 = arith.constant 0 : i32
    %c0_i32_2 = arith.constant 0 : i32
    %c0_i32_3 = arith.constant 0 : i32
    return %c0_i32, %c0_i32_0, %c0_i32_1, %c0_i32_2 : i32, i32, i32, i32
  }
  func.func @transform_2(%arg0: i32) -> (i32, i32, i32, i32) {
    %c0_i32 = arith.constant 0 : i32
    %c0_i32_0 = arith.constant 0 : i32
    %c0_i32_1 = arith.constant 0 : i32
    %c0_i32_2 = arith.constant 0 : i32
    return %arg0, %c0_i32, %c0_i32_0, %c0_i32_1 : i32, i32, i32, i32
  }
}

module attributes {stable_mosaic.version = 11 : i64} {
  func.func @_reeig_bimap_kernel(%arg0: i32, %arg1: memref<1x1x28x28xf32, #tpu.memory_space<vmem>>, %arg2: memref<1x1x1x28xf32, #tpu.memory_space<vmem>>, %arg3: memref<1x1x14x28xf32, #tpu.memory_space<vmem>>, %arg4: memref<1x1x14x14xf32, #tpu.memory_space<vmem>>) attributes {dimension_semantics = [#tpu.dimension_semantics<parallel>], iteration_bounds = array<i64: 4>, scalar_prefetch = 0 : i64, scratch_operands = 0 : i64, tpu.core_type = #tpu.core_type<tc>, window_params = [{transform_indices = @transform_0, window_bounds = array<i64: 1, 1, 28, 28>}, {transform_indices = @transform_1, window_bounds = array<i64: 1, 1, 1, 28>}, {pipeline_mode = #tpu.pipeline_mode<synchronous>, transform_indices = @transform_2, window_bounds = array<i64: 1, 1, 14, 28>}, {transform_indices = @transform_3, window_bounds = array<i64: 1, 1, 14, 14>}]} {
    %cst = arith.constant 0.000000e+00 : f32
    %0 = vector.broadcast %cst : f32 to vector<14x14xf32>
    %c0 = arith.constant 0 : index
    %c0_0 = arith.constant 0 : index
    %c0_1 = arith.constant 0 : index
    %c0_2 = arith.constant 0 : index
    %1 = vector.load %arg1[%c0, %c0_0, %c0_1, %c0_2] : memref<1x1x28x28xf32, #tpu.memory_space<vmem>>, vector<1x1x28x28xf32>
    %2 = vector.shape_cast %1 : vector<1x1x28x28xf32> to vector<28x28xf32>
    %c0_3 = arith.constant 0 : index
    %c0_4 = arith.constant 0 : index
    %c0_5 = arith.constant 0 : index
    %c0_6 = arith.constant 0 : index
    %3 = vector.load %arg2[%c0_3, %c0_4, %c0_5, %c0_6] : memref<1x1x1x28xf32, #tpu.memory_space<vmem>>, vector<1x1x1x28xf32>
    %4 = vector.shape_cast %3 : vector<1x1x1x28xf32> to vector<1x28xf32>
    %cst_7 = arith.constant 9.99999974E-5 : f32
    %5 = vector.broadcast %cst_7 : f32 to vector<1x28xf32>
    %6 = arith.maximumf %4, %5 : vector<1x28xf32>
    %c0_8 = arith.constant 0 : index
    %c0_9 = arith.constant 0 : index
    %c0_10 = arith.constant 0 : index
    %c0_11 = arith.constant 0 : index
    %7 = vector.load %arg3[%c0_8, %c0_9, %c0_10, %c0_11] : memref<1x1x14x28xf32, #tpu.memory_space<vmem>>, vector<1x1x14x28xf32>
    %8 = vector.shape_cast %7 : vector<1x1x14x28xf32> to vector<14x28xf32>
    %cst_12 = arith.constant dense<0.000000e+00> : vector<14x28xf32>
    %9 = tpu.matmul %8, %2, %cst_12 {dimension_numbers = #tpu.dot_dimension_numbers<[1], [0], [0], [1], [0, 0, 1, 1], [], []>} : vector<14x28xf32>, vector<28x28xf32>, vector<14x28xf32> -> vector<14x28xf32>
    %10 = vector.broadcast %6 : vector<1x28xf32> to vector<14x28xf32>
    %11 = arith.mulf %9, %10 : vector<14x28xf32>
    %cst_13 = arith.constant dense<0.000000e+00> : vector<14x14xf32>
    %12 = tpu.matmul %11, %9, %cst_13 {dimension_numbers = #tpu.dot_dimension_numbers<[1], [1], [0], [0], [0, 0, 1, 0], [], []>} : vector<14x28xf32>, vector<14x28xf32>, vector<14x14xf32> -> vector<14x14xf32>
    %13 = arith.addf %0, %12 : vector<14x14xf32>
    %c0_14 = arith.constant 0 : index
    %c0_15 = arith.constant 0 : index
    %c0_16 = arith.constant 0 : index
    %c0_17 = arith.constant 0 : index
    %14 = vector.load %arg4[%c0_14, %c0_15, %c0_16, %c0_17] : memref<1x1x14x14xf32, #tpu.memory_space<vmem>>, vector<1x1x14x14xf32>
    %15 = vector.shape_cast %14 : vector<1x1x14x14xf32> to vector<14x14xf32>
    %16 = vector.shape_cast %13 : vector<14x14xf32> to vector<1x1x14x14xf32>
    tpu.vector_store %arg4[%c0_14, %c0_15, %c0_16, %c0_17], %16 {strides = array<i32>} : memref<1x1x14x14xf32, #tpu.memory_space<vmem>>, vector<1x1x14x14xf32>,
    return
  }
  func.func @transform_0(%arg0: i32) -> (i32, i32, i32, i32) {
    %c0_i32 = arith.constant 0 : i32
    %c0_i32_0 = arith.constant 0 : i32
    %c0_i32_1 = arith.constant 0 : i32
    %c0_i32_2 = arith.constant 0 : i32
    return %arg0, %c0_i32, %c0_i32_0, %c0_i32_1 : i32, i32, i32, i32
  }
  func.func @transform_1(%arg0: i32) -> (i32, i32, i32, i32) {
    %c0_i32 = arith.constant 0 : i32
    %c0_i32_0 = arith.constant 0 : i32
    %c0_i32_1 = arith.constant 0 : i32
    %c0_i32_2 = arith.constant 0 : i32
    return %arg0, %c0_i32, %c0_i32_0, %c0_i32_1 : i32, i32, i32, i32
  }
  func.func @transform_2(%arg0: i32) -> (i32, i32, i32, i32) {
    %c0_i32 = arith.constant 0 : i32
    %c0_i32_0 = arith.constant 0 : i32
    %c0_i32_1 = arith.constant 0 : i32
    %c0_i32_2 = arith.constant 0 : i32
    %c0_i32_3 = arith.constant 0 : i32
    return %c0_i32, %c0_i32_0, %c0_i32_1, %c0_i32_2 : i32, i32, i32, i32
  }
  func.func @transform_3(%arg0: i32) -> (i32, i32, i32, i32) {
    %c0_i32 = arith.constant 0 : i32
    %c0_i32_0 = arith.constant 0 : i32
    %c0_i32_1 = arith.constant 0 : i32
    %c0_i32_2 = arith.constant 0 : i32
    return %arg0, %c0_i32, %c0_i32_0, %c0_i32_1 : i32, i32, i32, i32
  }
}

module attributes {stable_mosaic.version = 11 : i64} {
  func.func @_logeig_linear_kernel(%arg0: i32, %arg1: memref<1x1x14x14xf32, #tpu.memory_space<vmem>>, %arg2: memref<1x1x1x14xf32, #tpu.memory_space<vmem>>, %arg3: memref<2x1x14x14xf32, #tpu.memory_space<vmem>>, %arg4: memref<1x2x1xf32, #tpu.memory_space<vmem>>) attributes {dimension_semantics = [#tpu.dimension_semantics<parallel>], iteration_bounds = array<i64: 4>, scalar_prefetch = 0 : i64, scratch_operands = 0 : i64, tpu.core_type = #tpu.core_type<tc>, window_params = [{transform_indices = @transform_0, window_bounds = array<i64: 1, 1, 14, 14>}, {transform_indices = @transform_1, window_bounds = array<i64: 1, 1, 1, 14>}, {pipeline_mode = #tpu.pipeline_mode<synchronous>, transform_indices = @transform_2, window_bounds = array<i64: 2, 1, 14, 14>}, {transform_indices = @transform_3, window_bounds = array<i64: 1, 2, 1>}]} {
    %c0 = arith.constant 0 : index
    %c0_0 = arith.constant 0 : index
    %c0_1 = arith.constant 0 : index
    %c0_2 = arith.constant 0 : index
    %0 = vector.load %arg3[%c0, %c0_0, %c0_1, %c0_2] : memref<2x1x14x14xf32, #tpu.memory_space<vmem>>, vector<2x1x14x14xf32>
    %cst = arith.constant 0.000000e+00 : f32
    %1 = vector.broadcast %cst : f32 to vector<2x1xf32>
    %c0_3 = arith.constant 0 : index
    %c0_4 = arith.constant 0 : index
    %c0_5 = arith.constant 0 : index
    %c0_6 = arith.constant 0 : index
    %2 = vector.load %arg1[%c0_3, %c0_4, %c0_5, %c0_6] : memref<1x1x14x14xf32, #tpu.memory_space<vmem>>, vector<1x1x14x14xf32>
    %3 = vector.shape_cast %2 : vector<1x1x14x14xf32> to vector<14x14xf32>
    %c0_7 = arith.constant 0 : index
    %c0_8 = arith.constant 0 : index
    %c0_9 = arith.constant 0 : index
    %c0_10 = arith.constant 0 : index
    %4 = vector.load %arg2[%c0_7, %c0_8, %c0_9, %c0_10] : memref<1x1x1x14xf32, #tpu.memory_space<vmem>>, vector<1x1x1x14xf32>
    %5 = vector.shape_cast %4 : vector<1x1x1x14xf32> to vector<1x14xf32>
    %cst_11 = arith.constant 9.99999974E-5 : f32
    %6 = vector.broadcast %cst_11 : f32 to vector<1x14xf32>
    %7 = arith.maximumf %5, %6 : vector<1x14xf32>
    %8 = math.log %7 : vector<1x14xf32>
    %9 = vector.broadcast %8 : vector<1x14xf32> to vector<14x14xf32>
    %10 = arith.mulf %3, %9 : vector<14x14xf32>
    %cst_12 = arith.constant dense<0.000000e+00> : vector<14x14xf32>
    %11 = tpu.matmul %10, %3, %cst_12 {dimension_numbers = #tpu.dot_dimension_numbers<[1], [1], [0], [0], [0, 0, 1, 0], [], []>} : vector<14x14xf32>, vector<14x14xf32>, vector<14x14xf32> -> vector<14x14xf32>
    %12 = vector.shape_cast %0 : vector<2x1x14x14xf32> to vector<2x14x14xf32>
    %13 = vector.shape_cast %11 : vector<14x14xf32> to vector<1x14x14xf32>
    %14 = vector.broadcast %13 : vector<1x14x14xf32> to vector<2x14x14xf32>
    %15 = arith.mulf %14, %12 : vector<2x14x14xf32>
    %cst_13 = arith.constant dense<0.000000e+00> : vector<2x14xf32>
    %16 = vector.multi_reduction <add>, %15, %cst_13 [2] : vector<2x14x14xf32> to vector<2x14xf32>
    %cst_14 = arith.constant dense<0.000000e+00> : vector<2xf32>
    %17 = vector.multi_reduction <add>, %16, %cst_14 [1] : vector<2x14xf32> to vector<2xf32>
    %18 = vector.shape_cast %17 : vector<2xf32> to vector<2x1xf32>
    %19 = arith.addf %1, %18 : vector<2x1xf32>
    %c0_15 = arith.constant 0 : index
    %c0_16 = arith.constant 0 : index
    %c0_17 = arith.constant 0 : index
    %20 = vector.load %arg4[%c0_15, %c0_16, %c0_17] : memref<1x2x1xf32, #tpu.memory_space<vmem>>, vector<1x2x1xf32>
    %21 = vector.shape_cast %20 : vector<1x2x1xf32> to vector<2x1xf32>
    %22 = vector.shape_cast %19 : vector<2x1xf32> to vector<1x2x1xf32>
    tpu.vector_store %arg4[%c0_15, %c0_16, %c0_17], %22 {strides = array<i32>} : memref<1x2x1xf32, #tpu.memory_space<vmem>>, vector<1x2x1xf32>,
    return
  }
  func.func @transform_0(%arg0: i32) -> (i32, i32, i32, i32) {
    %c0_i32 = arith.constant 0 : i32
    %c0_i32_0 = arith.constant 0 : i32
    %c0_i32_1 = arith.constant 0 : i32
    %c0_i32_2 = arith.constant 0 : i32
    return %arg0, %c0_i32, %c0_i32_0, %c0_i32_1 : i32, i32, i32, i32
  }
  func.func @transform_1(%arg0: i32) -> (i32, i32, i32, i32) {
    %c0_i32 = arith.constant 0 : i32
    %c0_i32_0 = arith.constant 0 : i32
    %c0_i32_1 = arith.constant 0 : i32
    %c0_i32_2 = arith.constant 0 : i32
    return %arg0, %c0_i32, %c0_i32_0, %c0_i32_1 : i32, i32, i32, i32
  }
  func.func @transform_2(%arg0: i32) -> (i32, i32, i32, i32) {
    %c0_i32 = arith.constant 0 : i32
    %c0_i32_0 = arith.constant 0 : i32
    %c0_i32_1 = arith.constant 0 : i32
    %c0_i32_2 = arith.constant 0 : i32
    %c0_i32_3 = arith.constant 0 : i32
    return %c0_i32, %c0_i32_0, %c0_i32_1, %c0_i32_2 : i32, i32, i32, i32
  }
  func.func @transform_3(%arg0: i32) -> (i32, i32, i32) {
    %c0_i32 = arith.constant 0 : i32
    %c0_i32_0 = arith.constant 0 : i32
    %c0_i32_1 = arith.constant 0 : i32
    return %arg0, %c0_i32, %c0_i32_0 : i32, i32, i32
  }
}

</mosaic_0001>

<bundles_post_ra>
// kernel: custom-call.4
= control target key start
LH: loop header
LB: loop body
LE: loop exit
PB: predicated region body
PF: predicated region fallthrough
CT: control target
= control target key end

     0   :  { %s2642_s0 = inlined_call_operand.vmem [shape: f32[4,14,14], index: 0, kind: input, shape index: {}]   ;;  %s2643_s1 = inlined_call_operand.vmem [shape: f32[4,14,14], index: 1, kind: input, shape index: {}]   ;;  %s2644_s2 = inlined_call_operand.vmem [shape: f32[4,14,14], index: 2, kind: input, shape index: {}]   ;;  %s2645_s3 = inlined_call_operand.vmem [shape: f32[4,14,14], index: 3, kind: input, shape index: {}]   ;;  %s2646_s4 = inlined_call_operand.vmem [shape: f32[4,14], index: 4, kind: output, shape index: {0}]   ;;  %s2647_s5 = inlined_call_operand.vmem [shape: f32[4,14], index: 5, kind: output, shape index: {1}]   ;;  %s2648_s6 = inlined_call_operand.vmem [shape: f32[4,14,14], index: 6, kind: output, shape index: {2}]   ;;  %s2649_s7 = inlined_call_operand.vmem [shape: f32[4,14,14], index: 7, kind: output, shape index: {3}]   ;;  %s2650_s8 = inlined_call_operand.vmem [shape: f32[4,14,14], index: 8, kind: output, shape index: {4}]   ;;  %s2651_s9 = inlined_call_operand.vmem [shape: f32[4,14,14], index: 9, kind: output, shape index: {5}]  }
   0x1   :  { %2652 = sst [smem:[#allocation25_spill]] %s2642_s0 }
   0x2   :  { %s2119_s30 = smov 0   ;;  %s2121_s10 = smov 0  }
   0x3   :  { %s2123_s11 = smov 0  }
   0x4 LB: > { %s2135_s12 = sadd.s32 4294967295, %s2056_s11   ;;  %s2138_s13 = sadd.s32 1, %s2056_s11   ;;  %s2056_s11 = sphi %s2123_s11, %s2662_s11   ;;  %s2052_s10 = sphi %s2121_s10, %s2661_s10   ;;  %s2048_s30 = sphi %s2119_s30, %s2660_s30  }
   0x5   : > { %s20_s14 = sshrl.u32 %s2056_s11, 3  ;;  %s21_s15 = sshrl.u32 %s2138_s13, 3 }
   0x6   : > { %s22_s16 = ssub.s32 %s20_s14, %s21_s15  ;;  %s25_s17 = sadd.s32 1, %s2052_s10 }
   0x7   : > { %p23_p0 = scmp.eq.s32.totalorder %s22_s16, 0  ;;  %p35_p1 = scmp.ne.s32.totalorder %s2052_s10, %s2048_s30 }
   0x8   : > { %p36_p2 = scmp.eq.s32.totalorder %s2135_s12, 3  ;;  %p1814_p4 = scmp.ge.s32.totalorder %s2056_s11, 4 }
   0x9   : > { %s2147_s18 = scalar_select %p23_p0, %s2052_s10, %s25_s17  }
   0xa   : > { %p2149_p3 = por %p36_p2, %p35_p1  ;;  %86 = sbr.rel (%p1814_p4) target bundleno = 23 (0x17), region = 16 }
   0xb   : > { %s88_s20 = sand.u32 (!%p1814_p4), 1, %s2056_s11   ;;  %s1816_s21 = sshll.u32 (!%p1814_p4), %s2056_s11, 4 }
   0xc   : > { %s1815_s22 = sshll.u32 (!%p1814_p4), %s88_s20, 4  ;;  %s2654_s0 = sld [smem:[#allocation25_spill]] (!%p1814_p4) }
   0xd   : > { %s90_s26 = scalar_lea.vmem (!%p1814_p4), [#allocation0], %s1815_s22  ;;  %s117_s29 = scalar_lea.vmem (!%p1814_p4), %s2643_s1, %s1816_s21 }
   0xe   : > { %v130_v2 = vld [vmem:[%s117_s29] sm:$0xff] (!%p1814_p4)  ;;  %v132_v3 = vld [vmem:[%s117_s29 + $0x8] sm:$0xff] (!%p1814_p4)  ;;  %s142_s16 = scalar_lea.vmem (!%p1814_p4), %s2644_s2, %s1816_s21  ;;  %s115_s17 = scalar_lea.vmem (!%p1814_p4), [#allocation1], %s1815_s22 }
   0xf   : > { %131 = vst [vmem:[%s115_s17] sm:$0xff] (!%p1814_p4), %v130_v2  ;;  %133 = vst [vmem:[%s115_s17 + $0x8] sm:$0xff] (!%p1814_p4), %v132_v3  ;;  %v155_v4 = vld [vmem:[%s142_s16] sm:$0xff] (!%p1814_p4)  ;;  %v157_v5 = vld [vmem:[%s142_s16 + $0x8] sm:$0xff] (!%p1814_p4)  ;;  %s167_s24 = scalar_lea.vmem (!%p1814_p4), %s2645_s3, %s1816_s21 }
  0x10   : > { %v180_v6 = vld [vmem:[%s167_s24] sm:$0xff] (!%p1814_p4)  ;;  %v182_v7 = vld [vmem:[%s167_s24 + $0x8] sm:$0xff] (!%p1814_p4) }
  0x12   : > { %s92_s25 = scalar_lea.vmem %s2654_s0, %s1816_s21 }
  0x13   : > { %v105_v0 = vld [vmem:[%s92_s25] sm:$0xff]  ;;  %v107_v1 = vld [vmem:[%s92_s25 + $0x8] sm:$0xff]  ;;  %s140_s25 = scalar_lea.vmem [#allocation2], %s1815_s22 }
  0x14   : > { %106 = vst [vmem:[%s90_s26] sm:$0xff] %v105_v0  ;;  %108 = vst [vmem:[%s90_s26 + $0x8] sm:$0xff] %v107_v1  ;;  %s165_s26 = scalar_lea.vmem [#allocation3], %s1815_s22 }
  0x15   : > { %156 = vst [vmem:[%s140_s25] sm:$0xff] %v155_v4  ;;  %158 = vst [vmem:[%s140_s25 + $0x8] sm:$0xff] %v157_v5 }
  0x16   : > { %181 = vst [vmem:[%s165_s26] sm:$0xff] %v180_v6  ;;  %183 = vst [vmem:[%s165_s26 + $0x8] sm:$0xff] %v182_v7 }
  0x17 PF: > { %p1823_p5 = scmp.ge.s32.totalorder %s2056_s11, 1  ;;  %p188_p6 = scmp.lt.s32.totalorder %s2056_s11, 5 }
  0x19   : > { %p189_p7 = pnand %p1823_p5, %p188_p6 }
  0x1b   : > { %192 = sbr.rel (%p189_p7) target bundleno = 1056 (0x420), region = 96 }
  0x22   : > { %s195_s27 = sand.u32 1, %s2135_s12   ;;  %s229_s28 = sand.u32 1, %s2048_s30   ;;  %v297_v8 = vlaneseq  ;;  %v2066_v19 = vmov 0.0  }
  0x23   : > { %s2172_s21 = sshll.u32 %s195_s27, 4  ;;  %s2174_s22 = sshll.u32 %s229_s28, 2 }
  0x24   : > { %v2176_v9 = vshrl.u32 %v297_v8, 7  ;;  %s197_s29 = scalar_lea.vmem [#allocation0], %s2172_s21  ;;  %v2179_v12 = vand.u32 127, %v297_v8  ;;  %s201_s30 = scalar_lea.vmem [#allocation1], %s2172_s21 }
  0x25   : > { %v257_v10 = vld [vmem:[%s197_s29] sm:$0xff]  ;;  %v1834_v11 = vld [vmem:[%s197_s29 + $0x8] sm:$0xff]  ;;  %s205_s11 = scalar_lea.vmem [#allocation2], %s2172_s21  ;;  %s209_s14 = scalar_lea.vmem [#allocation3], %s2172_s21 }
  0x26   : > { %v302_v9 = vmov %v2176_v9  ;;  %v264_v13 = vld [vmem:[%s201_s30] sm:$0xff]  ;;  %v1836_v14 = vld [vmem:[%s201_s30 + $0x8] sm:$0xff]  ;;  %s2187_s15 = scalar_lea.vmem [#allocation8], %s2172_s21  ;;  %s2192_s16 = scalar_lea.vmem [#allocation9], %s2172_s21  ;;  %v299_v12 = vmov %v2179_v12  ;;  %vm1673_vm4 = vcmp.lt.s32.totalorder %v2179_v12, 14 }
  0x27   : > { %v271_v15 = vld [vmem:[%s205_s11] sm:$0xff]  ;;  %v322_v9 = vmov %v2176_v9  ;;  %v1838_v16 = vld [vmem:[%s205_s11 + $0x8] sm:$0xff]  ;;  %284 = vst [vmem:[%s2187_s15] sm:$0xff] %v2066_v19  ;;  %1842 = vst [vmem:[%s2187_s15 + $0x8] sm:$0xff] %v2066_v19  ;;  %s256_s17 = smov [#allocation12]  ;;  %s263_s20 = smov [#allocation13]  ;;  %v312_v20 = vadd.s32 8, %v302_v9  ;;  %v319_v12 = vmov %v2179_v12  ;;  %vm306_vm0 = vcmp.eq.s32.totalorder %v302_v9, %v299_v12 }
  0x28   : > { %v278_v17 = vld [vmem:[%s209_s14] sm:$0xff]  ;;  %v1840_v18 = vld [vmem:[%s209_s14 + $0x8] sm:$0xff]  ;;  %287 = vst [vmem:[%s2192_s16] sm:$0xff] %v2066_v19  ;;  %1843 = vst [vmem:[%s2192_s16 + $0x8] sm:$0xff] %v2066_v19  ;;  %s2197_s23 = scalar_lea.vmem [#allocation10], %s2172_s21  ;;  %s2202_s24 = scalar_lea.vmem [#allocation11], %s2172_s21  ;;  %v332_v21 = vadd.s32 8, %v322_v9  ;;  %vm326_vm2 = vcmp.eq.s32.totalorder %v322_v9, %v319_v12  ;;  %v1694_v9 = vmov %v2176_v9 }
  0x29   : > { %290 = vst [vmem:[%s2197_s23] sm:$0xff] %v2066_v19  ;;  %1844 = vst [vmem:[%s2197_s23 + $0x8] sm:$0xff] %v2066_v19  ;;  %s270_s25 = smov [#allocation14]  ;;  %s277_s26 = smov [#allocation15]  ;;  %vm313_vm1 = vcmp.eq.s32.totalorder %v312_v20, %v299_v12  ;;  %v1668_v9 = vmov %v2176_v9 }
  0x2a   : > { %293 = vst [vmem:[%s2202_s24] sm:$0xff] %v2066_v19  ;;  %1845 = vst [vmem:[%s2202_s24 + $0x8] sm:$0xff] %v2066_v19  ;;  %s296_s15 = smov %s2187_s15  ;;  %s316_s24 = smov %s2202_s24  ;;  %vm333_vm3 = vcmp.eq.s32.totalorder %v332_v21, %v319_v12  ;;  %v1665_v12 = vmov %v2179_v12  ;;  %v1684_v48 = vadd.s32 8, %v1668_v9 }
  0x2b   : > { %258 = vst [vmem:[%s256_s17] sm:$0xff] %v257_v10  ;;  %1835 = vst [vmem:[%s256_s17 + $0x8] sm:$0xff] %v1834_v11  ;;  %s1669_s21 = smov [#allocation12]  ;;  %s1695_s29 = smov [#allocation13]  ;;  %v1691_v12 = vmov %v2179_v12  ;;  %vm1678_vm5 = vcmp.eq.s32.totalorder %v1668_v9, %v1665_v12  ;;  %v1717_v9 = vmov %v2176_v9 }
  0x2c   : > { %265 = vst [vmem:[%s263_s20] sm:$0xff] %v264_v13  ;;  %1837 = vst [vmem:[%s263_s20 + $0x8] sm:$0xff] %v1836_v14  ;;  %s1718_s30 = smov [#allocation14]  ;;  %s1741_s11 = smov [#allocation15]  ;;  %v1714_v12 = vmov %v2179_v12  ;;  %vm1685_vm6 = vcmp.eq.s32.totalorder %v1684_v48, %v1665_v12  ;;  %v1740_v9 = vmov %v2176_v9 }
  0x2d   : > { %272 = vst [vmem:[%s270_s25] sm:$0xff] %v271_v15  ;;  %1839 = vst [vmem:[%s270_s25 + $0x8] sm:$0xff] %v1838_v16  ;;  %v1737_v12 = vmov %v2179_v12  ;;  %v1758_v62 = vadd.s32 8, %v1740_v9 }
  0x2e   : > { %279 = vst [vmem:[%s277_s26] sm:$0xff] %v278_v17  ;;  %1841 = vst [vmem:[%s277_s26 + $0x8] sm:$0xff] %v1840_v18  ;;  %v303_v22 = vld [vmem:[%s296_s15] sm:$0xff]  ;;  %v1846_v23 = vld [vmem:[%s296_s15 + $0x8] sm:$0x3f]  ;;  %vm1750_vm7 = vcmp.eq.s32.totalorder %v1740_v9, %v1737_v12 }
  0x2f   : > { %v307_v24 = vsel %vm306_vm0, 1.0, %v303_v22  ;;  %v314_v25 = vsel %vm313_vm1, 1.0, %v1846_v23  ;;  %vm1759_vm8 = vcmp.eq.s32.totalorder %v1758_v62, %v1737_v12 }
  0x30   : > { %308 = vst [vmem:[%s296_s15] sm:$0xff] %v307_v24  ;;  %1847 = vst [vmem:[%s296_s15 + $0x8] sm:$0x3f] %v314_v25 }
  0x31   : > { %v323_v26 = vld [vmem:[%s316_s24] sm:$0xff]  ;;  %v1848_v27 = vld [vmem:[%s316_s24 + $0x8] sm:$0x3f] }
  0x32   : > { %v327_v28 = vsel %vm326_vm2, 1.0, %v323_v26  ;;  %v334_v29 = vsel %vm333_vm3, 1.0, %v1848_v27  ;;  %v1675_v30 = vld [vmem:[%s1669_s21] sm:$0xff]  ;;  %v1850_v31 = vld [vmem:[%s1669_s21 + $0x8] sm:$0x3f] }
  0x33   : > { %328 = vst [vmem:[%s316_s24] sm:$0xff] %v327_v28  ;;  %1849 = vst [vmem:[%s316_s24 + $0x8] sm:$0x3f] %v334_v29  ;;  %v1701_v32 = vld [vmem:[%s1695_s29] sm:$0xff]  ;;  %v1676_v33 = vsel %vm1673_vm4, %v1675_v30, 0.0  ;;  %v1682_v34 = vsel %vm1673_vm4, %v1850_v31, 0.0 }
  0x34   : > { %v1702_v35 = vsel %vm1673_vm4, %v1701_v32, 0.0  ;;  %v1851_v36 = vld [vmem:[%s1695_s29 + $0x8] sm:$0x3f]  ;;  %v1724_v37 = vld [vmem:[%s1718_s30] sm:$0xff]  ;;  %v1677_v38 = vmul.f32 %v1676_v33, %v1676_v33  ;;  %v1683_v39 = vmul.f32 %v1682_v34, %v1682_v34 }
  0x35   : > { %v1703_v40 = vmul.f32 %v1702_v35, %v1702_v35  ;;  %v1708_v41 = vsel %vm1673_vm4, %v1851_v36, 0.0  ;;  %v1852_v42 = vld [vmem:[%s1718_s30 + $0x8] sm:$0x3f]  ;;  %v1725_v43 = vsel %vm1673_vm4, %v1724_v37, 0.0  ;;  %v1747_v46 = vld [vmem:[%s1741_s11] sm:$0xff] }
  0x36   : > { %v1688_v44 = vadd.f32 %v1683_v39, %v1677_v38  ;;  %v1709_v45 = vmul.f32 %v1708_v41, %v1708_v41  ;;  %v1731_v47 = vsel %vm1673_vm4, %v1852_v42, 0.0  ;;  %v1726_v50 = vmul.f32 %v1725_v43, %v1725_v43  ;;  %v1853_v51 = vld [vmem:[%s1741_s11 + $0x8] sm:$0x3f] }
  0x37   : > { %v1679_v52 = vsel %vm1678_vm5, 0.0, %v1677_v38  ;;  %v1748_v53 = vsel %vm1673_vm4, %v1747_v46, 0.0  ;;  %v1732_v55 = vmul.f32 %v1731_v47, %v1731_v47  ;;  %v1686_v56 = vsel %vm1685_vm6, 0.0, %v1683_v39 }
  0x38   : > { %v1705_v49 = vadd.f32 %v1703_v40, %v1688_v44  ;;  %v1756_v57 = vsel %vm1673_vm4, %v1853_v51, 0.0  ;;  %v1687_v58 = vadd.f32 %v1686_v56, %v1679_v52  ;;  %v1749_v60 = vmul.f32 %v1748_v53, %v1748_v53 }
  0x39   : > { %v1757_v0 = vmul.f32 %v1756_v57, %v1756_v57 }
  0x3a   : > { %v1711_v54 = vadd.f32 %v1709_v45, %v1705_v49  ;;  %v1704_v61 = vadd.f32 %v1703_v40, %v1687_v58  ;;  %v1751_v5 = vsel %vm1750_vm7, 0.0, %v1749_v60 }
  0x3b   : > { %v1760_v7 = vsel %vm1759_vm8, 0.0, %v1757_v0 }
  0x3c   : > { %v1728_v59 = vadd.f32 %v1726_v50, %v1711_v54  ;;  %v1710_v1 = vadd.f32 %v1709_v45, %v1704_v61 }
  0x3e   : > { %v1734_v63 = vadd.f32 %v1732_v55, %v1728_v59  ;;  %v1727_v3 = vadd.f32 %v1726_v50, %v1710_v1 }
  0x40   : > { %v1753_v2 = vadd.f32 %v1749_v60, %v1734_v63  ;;  %v1733_v6 = vadd.f32 %v1732_v55, %v1727_v3 }
  0x42   : > { %v1762_v4 = vadd.f32 %v1757_v0, %v1753_v2  ;;  %v1752_v8 = vadd.f32 %v1751_v5, %v1733_v6 }
  0x44   : > { %1763 = vadd.xlane.f32.xlu0 %v1762_v4  ;;  %v1761_v10 = vadd.f32 %v1760_v7, %v1752_v8 }
  0x48   : > { %1771 = vadd.xlane.f32.xlu0 %v1761_v10 }
  0xd1   : > { %v1764_v11 = vpop.xlane.xlu0 %1763 }
  0xd2   : > { %v1765_v13 = vrot.slane %v1764_v11, 4 }
  0xd4   : > { %v1766_v14 = vadd.f32 %v1765_v13, %v1764_v11 }
  0xd5   : > { %v1772_v16 = vpop.xlane.xlu0 %1771 }
  0xd6   : > { %v1767_v15 = vrot.slane %v1766_v14, 2  ;;  %v1773_v17 = vrot.slane %v1772_v16, 4 }
  0xd8   : > { %v1774_v18 = vadd.f32 %v1773_v17, %v1772_v16  ;;  %v1768_v19 = vadd.f32 %v1767_v15, %v1766_v14 }
  0xda   : > { %v1775_v20 = vrot.slane %v1774_v18, 2  ;;  %v1769_v22 = vrot.slane %v1768_v19, 1 }
  0xdc   : > { %v1776_v21 = vadd.f32 %v1775_v20, %v1774_v18  ;;  %v1770_v25 = vadd.f32 %v1769_v22, %v1768_v19 }
  0xde   : > { %v1777_v23 = vrot.slane %v1776_v21, 1 }
  0xe0   : > { %v1778_v24 = vadd.f32 %v1777_v23, %v1776_v21 }
  0xe2   : > { %1967 = vpush %v1778_v24 }
  0xe3   : > { %1969 = vpush %v1770_v25 }
 0x113   : > { %s1968_s14 = spop %1967 }
 0x114   : > { %s1970_s17 = spop %1969 }
 0x115   : > { %s1781_s20 = smul.f32 1e-10, %s1970_s17 }
 0x117   : > { %p1782_p8 = scmp.le.f32.partialorder %s1968_s14, %s1781_s20 }
 0x118   : > { %s2237_s25 = smov (!%p1782_p8), 0  }
 0x119   : > { %1785 = sbr.rel (%p1782_p8) target bundleno = 1008 (0x3f0), region = 448 }
 0x120 LB: >> { %s2242_s26 = smov 0   ;;  %s2060_s25 = sphi %s2237_s25, %s2655_s25  }
 0x121 LB: >>> { %s472_s21 = smov [#allocation12]  ;;  %v476_v12 = vmov %v2179_v12  ;;  %v479_v9 = vmov %v2176_v9  ;;  %s498_s29 = smov [#allocation13]  ;;  %vm1005_vm8 = vcmp.eq.s32.totalorder %v2176_v9, 0  ;;  %s2064_s26 = sphi %s2242_s26, %s471_s26  }
 0x122   : >>> { %v502_v12 = vmov %v2179_v12  ;;  %v505_v9 = vmov %v2176_v9  ;;  %v480_v26 = vld [vmem:[%s472_s21] sm:$0xff]  ;;  %vm483_vm9 = vcmp.eq.s32.totalorder %v479_v9, %v476_v12  ;;  %v1854_v27 = vld [vmem:[%s472_s21 + $0x8] sm:$0x3f]  ;;  %v488_v28 = vadd.s32 8, %v479_v9  ;;  %s524_s30 = smov [#allocation15]  ;;  %s473_s11 = smov [#allocation16] }
 0x123   : >>> { %vm509_vm10 = vcmp.eq.s32.totalorder %v505_v9, %v502_v12  ;;  %v528_v12 = vmov %v2179_v12  ;;  %v484_v29 = vsel %vm483_vm9, %v480_v26, 0.0  ;;  %v506_v30 = vld [vmem:[%s498_s29] sm:$0xff]  ;;  %v1855_v31 = vld [vmem:[%s498_s29 + $0x8] sm:$0x3f]  ;;  %v514_v32 = vadd.s32 8, %v505_v9  ;;  %s499_s14 = smov [#allocation17]  ;;  %s2270_s15 = smov %s2187_s15 }
 0x124   : >>> { %v531_v9 = vmov %v2176_v9  ;;  %vm489_vm11 = vcmp.eq.s32.totalorder %v488_v28, %v476_v12  ;;  %v510_v33 = vsel %vm509_vm10, %v506_v30, 0.0  ;;  %v532_v34 = vld [vmem:[%s524_s30] sm:$0xff]  ;;  %v1856_v35 = vld [vmem:[%s524_s30 + $0x8] sm:$0x3f]  ;;  %s525_s17 = smov [#allocation18]  ;;  %s554_s20 = smov [#allocation17] }
 0x125   : >>> { %vm535_vm12 = vcmp.eq.s32.totalorder %v531_v9, %v528_v12  ;;  %v540_v36 = vadd.s32 8, %v531_v9  ;;  %v490_v37 = vsel %vm489_vm11, %v1854_v27, %v484_v29  ;;  %vm515_vm13 = vcmp.eq.s32.totalorder %v514_v32, %v502_v12  ;;  %s552_s21 = smov [#allocation16]  ;;  %s556_s29 = smov [#allocation18] }
 0x126   : >>> { %v536_v38 = vsel %vm535_vm12, %v532_v34, 0.0  ;;  %v491_v39 = vrot.slane %v490_v37, 4  ;;  %v516_v40 = vsel %vm515_vm13, %v1855_v31, %v510_v33  ;;  %s591_s30 = smov [#allocation19]  ;;  %v621_v9 = vmov %v2176_v9  ;;  %s2265_s28 = smov [#allocation14] }
 0x127   : >>> { %vm541_vm14 = vcmp.eq.s32.totalorder %v540_v36, %v528_v12  ;;  %v517_v41 = vrot.slane %v516_v40, 4  ;;  %v652_v9 = vmov %v2176_v9  ;;  %v622_v28 = vadd.s32 8, %v621_v9  ;;  %s2267_s27 = smov [#allocation15]  ;;  %s2273_s16 = smov %s2192_s16 }
 0x128   : >>> { %v542_v42 = vsel %vm541_vm14, %v1856_v35, %v536_v38  ;;  %v492_v43 = vadd.f32 %v491_v39, %v490_v37  ;;  %v603_v12 = vmov %v2179_v12  ;;  %v606_v9 = vmov %v2176_v9  ;;  %s2277_s23 = smov %s2197_s23  ;;  %s2280_s24 = smov %s2202_s24 }
 0x129   : >>> { %v543_v44 = vrot.slane %v542_v42, 4  ;;  %v518_v45 = vadd.f32 %v517_v41, %v516_v40  ;;  %v618_v12 = vmov %v2179_v12  ;;  %v653_v29 = vadd.s32 8, %v652_v9  ;;  %s2458_s0 = smov [#allocation15]  ;;  %s471_s26 = sadd.s32 1, %s2064_s26  }
 0x12a   : >>> { %v493_v46 = vrot.slane %v492_v43, 2  ;;  %v634_v12 = vmov %v2179_v12  ;;  %v637_v9 = vmov %v2176_v9  ;;  %vm608_vm3 = vcmp.eq.s32.totalorder %v606_v9, %v603_v12  ;;  %p468_p9 = scmp.ge.s32.totalorder %s471_s26, 27  }
 0x12b   : >>> { %v544_v47 = vadd.f32 %v543_v44, %v542_v42  ;;  %v519_v48 = vrot.slane %v518_v45, 2  ;;  %v649_v12 = vmov %v2179_v12  ;;  %vm623_vm5 = vcmp.eq.s32.totalorder %v622_v28, %v618_v12  ;;  %v671_v44 = vld [vmem:[%s2265_s28] sm:$0xff] }
 0x12c   : >>> { %v494_v49 = vadd.f32 %v493_v46, %v492_v43  ;;  %vm639_vm6 = vcmp.eq.s32.totalorder %v637_v9, %v634_v12  ;;  %vm654_vm7 = vcmp.eq.s32.totalorder %v653_v29, %v649_v12  ;;  %v1093_v46 = vld [vmem:[%s2270_s15] sm:$0xff]  ;;  %vm1029_vm9 = vcmp.eq.s32.totalorder %v2176_v9, 5 }
 0x12d   : >>> { %v545_v50 = vrot.slane %v544_v47, 2  ;;  %v520_v51 = vadd.f32 %v519_v48, %v518_v45  ;;  %v672_v45 = vld [vmem:[%s2267_s27] sm:$0xff]  ;;  %vm1037_vm10 = vcmp.eq.s32.totalorder %v2176_v9, 7  ;;  %v808_v9 = vmov %v2176_v9 }
 0x12e   : >>> { %v495_v52 = vrot.slane %v494_v49, 1  ;;  %v786_v9 = vmov %v2176_v9  ;;  %v805_v12 = vmov %v2179_v12 }
 0x12f   : >>> { %v546_v53 = vadd.f32 %v545_v50, %v544_v47  ;;  %v521_v54 = vrot.slane %v520_v51, 1  ;;  %v1094_v47 = vld [vmem:[%s2273_s16] sm:$0xff]  ;;  %v828_v9 = vmov %v2176_v9  ;;  %v783_v12 = vmov %v2179_v12 }
 0x130   : >>> { %v496_v55 = vadd.f32 %v495_v52, %v494_v49  ;;  %v1095_v49 = vld [vmem:[%s2277_s23] sm:$0xff]  ;;  %v849_v9 = vmov %v2176_v9  ;;  %v825_v12 = vmov %v2179_v12  ;;  %vm812_vm11 = vcmp.eq.s32.totalorder %v808_v9, %v805_v12 }
 0x131   : >>> { %v547_v56 = vrot.slane %v546_v53, 1  ;;  %v522_v57 = vadd.f32 %v521_v54, %v520_v51  ;;  %v1096_v50 = vld [vmem:[%s2280_s24] sm:$0xff]  ;;  %v846_v12 = vmov %v2179_v12  ;;  %vm791_vm13 = vcmp.eq.s32.totalorder %v786_v9, %v783_v12 }
 0x132   : >>> { %497 = vst [vmem:[%s473_s11] sm:$0x1] %v496_v55  ;;  %s593_s11 = smov [#allocation20] }
 0x133   : >>> { %v548_v58 = vadd.f32 %v547_v56, %v546_v53  ;;  %523 = vst [vmem:[%s499_s14] sm:$0x1] %v522_v57  ;;  %s550_s14 = smov [#allocation21] }
 0x134   : >>> { %s595_s14 = smov %s550_s14 }
 0x135   : >>> { %549 = vst [vmem:[%s525_s17] sm:$0x1] %v548_v58  ;;  %s551_s17 = smov [#allocation22] }
 0x136   : >>> { %s597_s17 = smov %s551_s17 }
 0x139   : >>> { %v553_v61 = vld [vmem:[%s552_s21] sm:$0xff]  ;;  %s614_s21 = smov [#allocation21] }
 0x13a   : >>> { %v555_v59 = vld [vmem:[%s554_s20] sm:$0xff]  ;;  %v576_v11 = vand.u32 2147483647, %v553_v61  ;;  %s599_s20 = smov [#allocation21] }
 0x13b   : >>> { %v559_v60 = vmul.f32 2.0, %v555_v59  ;;  %v577_v17 = vand.u32 2147483647, %v555_v59 }
 0x13c   : >>> { %v557_v62 = vld [vmem:[%s556_s29] sm:$0xff]  ;;  %s630_s29 = smov [#allocation22] }
 0x13d   : >>> { %2018 = vrcp.f32 %v559_v60  ;;  %v558_v63 = vsub.f32 %v557_v62, %v553_v61  ;;  %v578_v13 = vand.u32 2147483647, %v557_v62 }
 0x13f   : >>> { %v579_v16 = vmin.f32 %v576_v11, %v578_v13 }
 0x141   : >>> { %v580_v18 = vmul.f32 1.1920929e-08, %v579_v16 }
 0x143   : >>> { %vm581_vm2 = vcmp.le.f32.partialorder %v577_v17, %v580_v18 }
 0x147   : >>> { %v2019_v0 = vpop.eup %2018 }
 0x148   : >>> { %v561_v1 = vmul.f32 %v2019_v0, %v558_v63 }
 0x14a   : >>> { %v563_v2 = vmul.f32 %v561_v1, %v561_v1  ;;  %vm562_vm1 = vcmp.ge.f32.partialorder %v561_v1, 0.0 }
 0x14c   : >>> { %v564_v3 = vadd.f32 1.0, %v563_v2 }
 0x14e   : >>> { %2020 = vrsqrt.f32 %v564_v3  ;;  %vm567_vm15 = vcmp.eq.f32.partialorder %v564_v3, inf  ;;  %v570_v5 = vand.u32 2147483648, %v564_v3  ;;  %vm569_vm0 = vcmp.eq.f32.partialorder %v564_v3, 0.0 }
 0x158   : >>> { %v2021_v4 = vpop.eup %2020 }
 0x159   : >>> { %v566_v6 = vmul.f32 %v2021_v4, %v564_v3 }
 0x15b   : >>> { %v568_v7 = vsel %vm567_vm15, %v564_v3, %v566_v6  ;;  %vm832_vm15 = vcmp.eq.s32.totalorder %v828_v9, %v825_v12 }
 0x15c   : >>> { %v571_v8 = vsel %vm569_vm0, %v570_v5, %v568_v7  ;;  %vm854_vm0 = vcmp.eq.s32.totalorder %v849_v9, %v846_v12 }
 0x15d   : >>> { %v572_v10 = vxor.u32 2147483648, %v571_v8 }
 0x15f   : >>> { %v573_v14 = vsel %vm562_vm1, %v571_v8, %v572_v10 }
 0x160   : >>> { %v574_v15 = vadd.f32 %v573_v14, %v561_v1 }
 0x162   : >>> { %2022 = vrcp.f32 %v574_v15 }
 0x16c   : >>> { %v2023_v19 = vpop.eup %2022 }
 0x16d   : >>> { %v582_v20 = vsel %vm581_vm2, 0.0, %v2023_v19 }
 0x16e   : >>> { %v583_v21 = vmul.f32 %v582_v20, %v582_v20  ;;  %v587_v22 = vmul.f32 %v582_v20, %v555_v59 }
 0x170   : >>> { %v584_v23 = vadd.f32 1.0, %v583_v21  ;;  %v588_v24 = vsub.f32 %v553_v61, %v587_v22  ;;  %v590_v25 = vadd.f32 %v587_v22, %v557_v62 }
 0x172   : >>> { %2024 = vrsqrt.f32 %v584_v23  ;;  %592 = vst [vmem:[%s591_s30] sm:$0xff] %v588_v24  ;;  %594 = vst [vmem:[%s593_s11] sm:$0xff] %v590_v25  ;;  %s645_s30 = smov [#allocation22]  ;;  %s612_s11 = smov [#allocation23] }
 0x17c   : >>> { %v2025_v26 = vpop.eup %2024 }
 0x17d   : >>> { %596 = vst [vmem:[%s595_s14] sm:$0xff] %v2025_v26  ;;  %v586_v27 = vmul.f32 %v2025_v26, %v582_v20  ;;  %s627_s14 = smov [#allocation23] }
 0x17f   : >>> { %598 = vst [vmem:[%s597_s17] sm:$0xff] %v586_v27  ;;  %s661_s17 = smov [#allocation23] }
 0x184   : >>> { %v600_v30 = vld [vmem:[%s599_s20] ss:$0 sm:$0xff]  ;;  %s643_s20 = smov [#allocation24] }
 0x185   : >>> { %v615_v31 = vld [vmem:[%s614_s21] ss:$0 sm:$0xff]  ;;  %v609_v32 = vsel %vm608_vm3, %v600_v30, 0.0  ;;  %s2261_s21 = smov [#allocation12]  ;;  %vm876_vm3 = vcmp.eq.s32.totalorder %v2179_v12, 0 }
 0x186   : >>> { %v624_v33 = vsel %vm623_vm5, %v615_v31, 0.0  ;;  %610 = vadd.xlane.f32.xlu0 %v609_v32  ;;  %v631_v34 = vld [vmem:[%s630_s29] ss:$0 sm:$0xff]  ;;  %s658_s29 = smov [#allocation24]  ;;  %vm880_vm5 = vcmp.eq.s32.totalorder %v2179_v12, 1 }
 0x187   : >>> { %625 = vadd.xlane.f32.xlu1 %v624_v33  ;;  %v646_v35 = vld [vmem:[%s645_s30] ss:$0 sm:$0xff]  ;;  %v640_v36 = vsel %vm639_vm6, %v631_v34, 0.0  ;;  %s2263_s30 = smov [#allocation13]  ;;  %vm893_vm6 = vcmp.eq.s32.totalorder %v2179_v12, 13 }
 0x188   : >>> { %v655_v37 = vsel %vm654_vm7, %v646_v35, 0.0  ;;  %v669_v42 = vld [vmem:[%s2261_s21] sm:$0xff] }
 0x189   : >>> { %v670_v43 = vld [vmem:[%s2263_s30] sm:$0xff] }
 0x18a   : >>> { %641 = vadd.xlane.f32.xlu0 %v640_v36 }
 0x18b   : >>> { %656 = vadd.xlane.f32.xlu1 %v655_v37 }
 0x213   : >>> { %v611_v38 = vpop.xlane.xlu0 %610 }
 0x214   : >>> { %v626_v39 = vpop.xlane.xlu1 %625  ;;  %613 = vst [vmem:[%s612_s11] sm:$0xff] %v611_v38  ;;  %s1085_s11 = smov [#allocation23] }
 0x215   : >>> { %1857 = vst [vmem:[%s627_s14 + $0x8] sm:$0xff] %v626_v39  ;;  %s663_s14 = smov [#allocation24] }
 0x217   : >>> { %v642_v40 = vpop.xlane.xlu0 %641 }
 0x218   : >>> { %v657_v41 = vpop.xlane.xlu1 %656  ;;  %644 = vst [vmem:[%s643_s20] sm:$0xff] %v642_v40  ;;  %s1087_s20 = smov [#allocation24] }
 0x219   : >>> { %1858 = vst [vmem:[%s658_s29 + $0x8] sm:$0xff] %v657_v41  ;;  %s1113_s29 = smov [#allocation23] }
 0x21c   : >>> { %v662_v48 = vld [vmem:[%s661_s17] sm:$0xff]  ;;  %s689_s17 = smov [#allocation23]  ;;  %v1917_v17 = vld [vmem:[%s1113_s29 + $0x8] sm:$0xff]  ;;  %s2337_s29 = smov [#allocation12] }
 0x21d   : >>> { %v1086_v51 = vld [vmem:[%s1085_s11] sm:$0xff]  ;;  %v673_v52 = vmul.f32 %v669_v42, %v662_v48  ;;  %v676_v53 = vmul.f32 %v670_v43, %v662_v48  ;;  %v680_v54 = vmul.f32 %v671_v44, %v662_v48  ;;  %v683_v55 = vmul.f32 %v672_v45, %v662_v48  ;;  %s692_s11 = smov [#allocation24]  ;;  %v1859_v16 = vld [vmem:[%s689_s17 + $0x8] sm:$0xff]  ;;  %s725_s17 = smov [#allocation22] }
 0x21e   : >>> { %v1097_v56 = vmul.f32 %v1093_v46, %v1086_v51  ;;  %v1100_v57 = vmul.f32 %v1094_v47, %v1086_v51  ;;  %v1104_v58 = vmul.f32 %v1095_v49, %v1086_v51  ;;  %v1107_v59 = vmul.f32 %v1096_v50, %v1086_v51 }
 0x220   : >>> { %v664_v60 = vld [vmem:[%s663_s14] sm:$0xff]  ;;  %s2297_s14 = smov [#allocation12]  ;;  %v1860_v18 = vld [vmem:[%s692_s11 + $0x8] sm:$0xff]  ;;  %s2343_s11 = smov [#allocation13] }
 0x221   : >>> { %v1088_v61 = vld [vmem:[%s1087_s20] sm:$0xff]  ;;  %v674_v62 = vmul.f32 %v671_v44, %v664_v60  ;;  %v677_v63 = vmul.f32 %v672_v45, %v664_v60  ;;  %v679_v0 = vmul.f32 %v669_v42, %v664_v60  ;;  %v682_v1 = vmul.f32 %v670_v43, %v664_v60  ;;  %s2299_s20 = smov [#allocation14] }
 0x222   : >>> { %v1098_v2 = vmul.f32 %v1095_v49, %v1088_v61  ;;  %v1101_v3 = vmul.f32 %v1096_v50, %v1088_v61  ;;  %v1103_v4 = vmul.f32 %v1093_v46, %v1088_v61  ;;  %v1106_v5 = vmul.f32 %v1094_v47, %v1088_v61 }
 0x223   : >>> { %v675_v6 = vsub.f32 %v673_v52, %v674_v62  ;;  %v678_v7 = vsub.f32 %v676_v53, %v677_v63  ;;  %v681_v8 = vadd.f32 %v680_v54, %v679_v0  ;;  %v684_v10 = vadd.f32 %v683_v55, %v682_v1  ;;  %v2353_v53 = vld [vmem:[%s725_s17] ss:$0 sm:$0xff]  ;;  %s780_s17 = smov [#allocation19] }
 0x224   : >>> { %v1099_v11 = vsub.f32 %v1097_v56, %v1098_v2  ;;  %v1102_v13 = vsub.f32 %v1100_v57, %v1101_v3  ;;  %v1105_v14 = vadd.f32 %v1104_v58, %v1103_v4  ;;  %v1108_v15 = vadd.f32 %v1107_v59, %v1106_v5 }
 0x225   : >>> { %685 = vst [vmem:[%s2261_s21] sm:$0xff] %v675_v6  ;;  %687 = vst [vmem:[%s2265_s28] sm:$0xff] %v681_v8  ;;  %s1116_s21 = smov [#allocation24]  ;;  %s2301_s28 = smov [#allocation15] }
 0x226   : >>> { %688 = vst [vmem:[%s2267_s27] sm:$0xff] %v684_v10  ;;  %686 = vst [vmem:[%s2263_s30] sm:$0xff] %v678_v7  ;;  %v1918_v19 = vld [vmem:[%s1116_s21 + $0x8] sm:$0xff]  ;;  %s2315_s27 = smov [#allocation13]  ;;  %s723_s30 = smov [#allocation21] }
 0x227   : >>> { %1109 = vst [vmem:[%s2270_s15] sm:$0xff] %v1099_v11  ;;  %1110 = vst [vmem:[%s2273_s16] sm:$0xff] %v1102_v13  ;;  %s2304_s15 = smov %s2187_s15  ;;  %s2307_s16 = smov %s2192_s16  ;;  %v2351_v52 = vld [vmem:[%s723_s30] ss:$0 sm:$0xff] }
 0x228   : >>> { %1111 = vst [vmem:[%s2277_s23] sm:$0xff] %v1105_v14  ;;  %1112 = vst [vmem:[%s2280_s24] sm:$0xff] %v1108_v15  ;;  %s2310_s23 = smov %s2197_s23  ;;  %s2313_s24 = smov %s2202_s24 }
 0x229   : >>> { %s751_s21 = smov [#allocation12]  ;;  %s757_s30 = smov [#allocation15] }
 0x22c   : >>> { %v1861_v20 = vld [vmem:[%s2297_s14 + $0x8] sm:$0x3f] }
 0x22d   : >>> { %v1863_v21 = vld [vmem:[%s2299_s20 + $0x8] sm:$0x3f]  ;;  %v707_v23 = vmul.f32 %v1861_v20, %v1859_v16  ;;  %v713_v26 = vmul.f32 %v1861_v20, %v1860_v18 }
 0x22e   : >>> { %v1864_v22 = vld [vmem:[%s2301_s28 + $0x8] sm:$0x3f]  ;;  %v708_v24 = vmul.f32 %v1863_v21, %v1860_v18  ;;  %v714_v30 = vmul.f32 %v1863_v21, %v1859_v16 }
 0x22f   : >>> { %v711_v25 = vmul.f32 %v1864_v22, %v1860_v18  ;;  %v1919_v27 = vld [vmem:[%s2304_s15 + $0x8] sm:$0x3f]  ;;  %v717_v31 = vmul.f32 %v1864_v22, %v1859_v16 }
 0x230   : >>> { %v1920_v28 = vld [vmem:[%s2307_s16 + $0x8] sm:$0x3f]  ;;  %v1131_v33 = vmul.f32 %v1919_v27, %v1917_v17  ;;  %v709_v36 = vsub.f32 %v707_v23, %v708_v24  ;;  %v1137_v39 = vmul.f32 %v1919_v27, %v1918_v19  ;;  %v715_v40 = vadd.f32 %v714_v30, %v713_v26 }
 0x231   : >>> { %v1921_v29 = vld [vmem:[%s2310_s23 + $0x8] sm:$0x3f]  ;;  %v1134_v37 = vmul.f32 %v1920_v28, %v1917_v17  ;;  %v1140_v43 = vmul.f32 %v1920_v28, %v1918_v19 }
 0x232   : >>> { %v1922_v32 = vld [vmem:[%s2313_s24 + $0x8] sm:$0x3f]  ;;  %v1132_v34 = vmul.f32 %v1921_v29, %v1918_v19  ;;  %v1138_v42 = vmul.f32 %v1921_v29, %v1917_v17  ;;  %1865 = vst [vmem:[%s2297_s14 + $0x8] sm:$0x3f] %v709_v36  ;;  %1867 = vst [vmem:[%s2299_s20 + $0x8] sm:$0x3f] %v715_v40 }
 0x233   : >>> { %v1862_v35 = vld [vmem:[%s2315_s27 + $0x8] sm:$0x3f]  ;;  %v1135_v38 = vmul.f32 %v1922_v32, %v1918_v19  ;;  %v1141_v45 = vmul.f32 %v1922_v32, %v1917_v17  ;;  %s2347_s14 = smov [#allocation14]  ;;  %s2349_s20 = smov [#allocation15] }
 0x234   : >>> { %v1133_v41 = vsub.f32 %v1131_v33, %v1132_v34  ;;  %v710_v46 = vmul.f32 %v1862_v35, %v1859_v16  ;;  %v716_v47 = vmul.f32 %v1862_v35, %v1860_v18  ;;  %v1139_v48 = vadd.f32 %v1138_v42, %v1137_v39 }
 0x235   : >>> { %v1136_v44 = vsub.f32 %v1134_v37, %v1135_v38  ;;  %v1142_v49 = vadd.f32 %v1141_v45, %v1140_v43 }
 0x236   : >>> { %1923 = vst [vmem:[%s2304_s15 + $0x8] sm:$0x3f] %v1133_v41  ;;  %v712_v50 = vsub.f32 %v710_v46, %v711_v25  ;;  %v718_v51 = vadd.f32 %v717_v31, %v716_v47  ;;  %1925 = vst [vmem:[%s2310_s23 + $0x8] sm:$0x3f] %v1139_v48  ;;  %s1147_s15 = smov %s2187_s15  ;;  %s2335_s23 = smov %s2197_s23 }
 0x237   : >>> { %1924 = vst [vmem:[%s2307_s16 + $0x8] sm:$0x3f] %v1136_v44  ;;  %1926 = vst [vmem:[%s2313_s24 + $0x8] sm:$0x3f] %v1142_v49  ;;  %s2341_s16 = smov %s2192_s16  ;;  %s2357_s24 = smov %s2202_s24 }
 0x238   : >>> { %1866 = vst [vmem:[%s2315_s27 + $0x8] sm:$0x3f] %v712_v50  ;;  %1868 = vst [vmem:[%s2301_s28 + $0x8] sm:$0x3f] %v718_v51  ;;  %s753_s28 = smov [#allocation13]  ;;  %s755_s27 = smov [#allocation14] }
 0x239   : >>> { %v731_v57 = vld [vmem:[%s2337_s29] sm:$0xff]  ;;  %v818_v50 = vadd.s32 8, %v808_v9  ;;  %v798_v51 = vadd.s32 8, %v786_v9 }
 0x23a   : >>> { %v735_v17 = vmul.f32 %v731_v57, %v2351_v52  ;;  %v738_v18 = vmul.f32 %v731_v57, %v2353_v53  ;;  %v733_v22 = vld [vmem:[%s2347_s14] sm:$0xff] }
 0x23b   : >>> { %v741_v26 = vmul.f32 %v733_v22, %v2351_v52  ;;  %v744_v28 = vmul.f32 %v733_v22, %v2353_v53  ;;  %vm819_vm12 = vcmp.eq.s32.totalorder %v818_v50, %v805_v12  ;;  %vm799_vm14 = vcmp.eq.s32.totalorder %v798_v51, %v783_v12 }
 0x23d   : >>> { %v1149_v54 = vld [vmem:[%s1147_s15] ss:$0 sm:$0xff]  ;;  %v1928_v56 = vld [vmem:[%s1147_s15 + $0x7] ss:$0 sm:$0xff]  ;;  %v1929_v59 = vld [vmem:[%s1147_s15 + $0x7] sm:$0x3e] }
 0x23e   : >>> { %v1927_v55 = vld [vmem:[%s1147_s15 - $0x1] sm:$0xfe]  ;;  %v1930_v60 = vld [vmem:[%s1147_s15 + $0xd] ss:$0 sm:$0xff]  ;;  %v1167_v62 = vsel %vm1005_vm8, %v1928_v56, %v1929_v59  ;;  %v1934_v1 = vld [vmem:[%s2335_s23 + $0x8] ss:$0 sm:$0xff] }
 0x23f   : >>> { %v1156_v58 = vsel %vm1005_vm8, %v1149_v54, %v1927_v55  ;;  %v1193_v61 = vld [vmem:[%s2341_s16] ss:$0 sm:$0xff]  ;;  %v1933_v0 = vld [vmem:[%s2335_s23 + $0x9] sm:$0x1f]  ;;  %1931 = vst [vmem:[%s1147_s15 + $0x8] sm:$0x3f] %v1167_v62 }
 0x240   : >>> { %1159 = vst [vmem:[%s1147_s15] sm:$0xff] %v1156_v58  ;;  %v1171_v63 = vld [vmem:[%s2335_s23] ss:$0 sm:$0xff]  ;;  %v1180_v2 = vsel %vm1029_vm9, %v1930_v60, %v1933_v0  ;;  %v1936_v3 = vld [vmem:[%s2335_s23 + $0x1] sm:$0x7f]  ;;  %v1939_v8 = vld [vmem:[%s2341_s16 + $0x7] sm:$0x3e] }
 0x241   : >>> { %1932 = vst [vmem:[%s1147_s15 + $0x1] sm:$0x1] %v1171_v63  ;;  %v1937_v4 = vld [vmem:[%s2341_s16 - $0x1] sm:$0xfe]  ;;  %v1938_v5 = vld [vmem:[%s2341_s16 + $0x7] ss:$0 sm:$0xff]  ;;  %v1188_v6 = vsel %vm1037_vm10, %v1934_v1, %v1936_v3 }
 0x242   : >>> { %1935 = vst [vmem:[%s2335_s23 + $0x8] sm:$0x3f] %v1180_v2  ;;  %v1200_v7 = vsel %vm1005_vm8, %v1193_v61, %v1937_v4  ;;  %v1940_v10 = vld [vmem:[%s2341_s16 + $0xd] ss:$0 sm:$0xff]  ;;  %v1215_v11 = vld [vmem:[%s2357_s24] ss:$0 sm:$0xff]  ;;  %1190 = vst [vmem:[%s2335_s23] sm:$0xff] %v1188_v6  ;;  %v1211_v13 = vsel %vm1005_vm8, %v1938_v5, %v1939_v8 }
 0x243   : >>> { %1203 = vst [vmem:[%s2341_s16] sm:$0xff] %v1200_v7  ;;  %v1943_v14 = vld [vmem:[%s2357_s24 + $0x9] sm:$0x1f]  ;;  %v1944_v15 = vld [vmem:[%s2357_s24 + $0x8] ss:$0 sm:$0xff]  ;;  %v1946_v16 = vld [vmem:[%s2357_s24 + $0x1] sm:$0x7f] }
 0x244   : >>> { %1941 = vst [vmem:[%s2341_s16 + $0x8] sm:$0x3f] %v1211_v13  ;;  %1942 = vst [vmem:[%s2341_s16 + $0x1] sm:$0x1] %v1215_v11  ;;  %v1224_v19 = vsel %vm1029_vm9, %v1940_v10, %v1943_v14  ;;  %v1232_v20 = vsel %vm1037_vm10, %v1944_v15, %v1946_v16  ;;  %v732_v21 = vld [vmem:[%s2343_s11] sm:$0xff] }
 0x245   : >>> { %v734_v23 = vld [vmem:[%s2349_s20] sm:$0xff]  ;;  %1945 = vst [vmem:[%s2357_s24 + $0x8] sm:$0x3f] %v1224_v19  ;;  %1234 = vst [vmem:[%s2357_s24] sm:$0xff] %v1232_v20  ;;  %v736_v24 = vmul.f32 %v732_v21, %v2353_v53  ;;  %v739_v25 = vmul.f32 %v732_v21, %v2351_v52 }
 0x246   : >>> { %v742_v27 = vmul.f32 %v734_v23, %v2353_v53  ;;  %v745_v29 = vmul.f32 %v734_v23, %v2351_v52  ;;  %v787_v54 = vld [vmem:[%s780_s17] ss:$0 sm:$0xff]  ;;  %s2443_s17 = smov [#allocation12] }
 0x247   : >>> { %v737_v30 = vsub.f32 %v735_v17, %v736_v24  ;;  %v740_v31 = vadd.f32 %v739_v25, %v738_v18 }
 0x248   : >>> { %v743_v32 = vsub.f32 %v741_v26, %v742_v27  ;;  %v746_v33 = vadd.f32 %v745_v29, %v744_v28 }
 0x249   : >>> { %747 = vst [vmem:[%s2337_s29] sm:$0xff] %v737_v30  ;;  %748 = vst [vmem:[%s2343_s11] sm:$0xff] %v740_v31  ;;  %s843_s29 = smov [#allocation20]  ;;  %s802_s11 = smov [#allocation13] }
 0x24a   : >>> { %749 = vst [vmem:[%s2347_s14] sm:$0xff] %v743_v32  ;;  %750 = vst [vmem:[%s2349_s20] sm:$0xff] %v746_v33  ;;  %s2426_s14 = smov [#allocation12]  ;;  %s822_s20 = smov [#allocation14]  ;;  %v850_v55 = vld [vmem:[%s843_s29] ss:$0 sm:$0xff] }
 0x24b   : >>> { %s2446_s29 = smov [#allocation14] }
 0x250   : >>> { %v1869_v34 = vld [vmem:[%s751_s21 + $0x8] sm:$0x3f] }
 0x251   : >>> { %v1870_v35 = vld [vmem:[%s753_s28 + $0x8] sm:$0x3f]  ;;  %v766_v37 = vmul.f32 %v1869_v34, %v2353_v53  ;;  %v763_v39 = vmul.f32 %v1869_v34, %v2351_v52 }
 0x252   : >>> { %v1871_v36 = vld [vmem:[%s755_s27 + $0x8] sm:$0x3f]  ;;  %v767_v38 = vmul.f32 %v1870_v35, %v2351_v52  ;;  %v764_v40 = vmul.f32 %v1870_v35, %v2353_v53 }
 0x253   : >>> { %v1872_v41 = vld [vmem:[%s757_s30 + $0x8] sm:$0x3f]  ;;  %v769_v42 = vmul.f32 %v1871_v36, %v2351_v52  ;;  %v772_v44 = vmul.f32 %v1871_v36, %v2353_v53 }
 0x254   : >>> { %v770_v43 = vmul.f32 %v1872_v41, %v2353_v53  ;;  %v773_v45 = vmul.f32 %v1872_v41, %v2351_v52  ;;  %v768_v46 = vadd.f32 %v767_v38, %v766_v37  ;;  %v765_v47 = vsub.f32 %v763_v39, %v764_v40 }
 0x255   : >>> { %v838_v52 = vadd.s32 8, %v828_v9  ;;  %v861_v53 = vadd.s32 8, %v849_v9  ;;  %v343_v9 = vmov (%p468_p9), %v2176_v9 }
 0x256   : >>> { %v771_v48 = vsub.f32 %v769_v42, %v770_v43  ;;  %v774_v49 = vadd.f32 %v773_v45, %v772_v44  ;;  %1874 = vst [vmem:[%s753_s28 + $0x8] sm:$0x3f] %v768_v46  ;;  %1873 = vst [vmem:[%s751_s21 + $0x8] sm:$0x3f] %v765_v47  ;;  %s842_s21 = smov [#allocation15]  ;;  %s2437_s28 = smov [#allocation13]  ;;  %v372_v9 = vmov (%p468_p9), %v2176_v9 }
 0x257   : >>> { %vm839_vm1 = vcmp.eq.s32.totalorder %v838_v52, %v825_v12  ;;  %vm862_vm2 = vcmp.eq.s32.totalorder %v861_v53, %v846_v12  ;;  %v340_v12 = vmov (%p468_p9), %v2179_v12 }
 0x258   : >>> { %1875 = vst [vmem:[%s755_s27 + $0x8] sm:$0x3f] %v771_v48  ;;  %1876 = vst [vmem:[%s757_s30 + $0x8] sm:$0x3f] %v774_v49  ;;  %s2439_s27 = smov [#allocation12]  ;;  %s2067_s30 = smov 1   ;;  %v369_v12 = vmov (%p468_p9), %v2179_v12  ;;  %vm355_vm7 = vcmp.eq.s32.totalorder (%p468_p9), %v343_v9, %v340_v12 }
 0x259   : >> { %v392_v12 = vmov (%p468_p9), %v2179_v12 }
 0x25d   : >>> { %v809_v56 = vld [vmem:[%s802_s11] sm:$0xff]  ;;  %v1879_v57 = vld [vmem:[%s802_s11 + $0x8] sm:$0x3f] }
 0x25e   : >>> { %v788_v58 = vld [vmem:[%s2426_s14] sm:$0xff]  ;;  %v813_v59 = vsel %vm812_vm11, 0.0, %v809_v56  ;;  %v820_v60 = vsel %vm819_vm12, 0.0, %v1879_v57  ;;  %v1877_v62 = vld [vmem:[%s2426_s14 + $0x8] sm:$0x3f] }
 0x25f   : >>> { %v792_v61 = vsel %vm791_vm13, %v787_v54, %v788_v58  ;;  %v829_v63 = vld [vmem:[%s822_s20] sm:$0xff]  ;;  %814 = vst [vmem:[%s802_s11] sm:$0xff] %v813_v59  ;;  %1880 = vst [vmem:[%s802_s11 + $0x8] sm:$0x3f] %v820_v60  ;;  %v800_v1 = vsel %vm799_vm14, %v787_v54, %v1877_v62  ;;  %v1881_v3 = vld [vmem:[%s822_s20 + $0x8] sm:$0x3f]  ;;  %s2068_s11 = smov 127  }
 0x260   : >>> { %v851_v0 = vld [vmem:[%s842_s21] sm:$0xff]  ;;  %793 = vst [vmem:[%s2426_s14] sm:$0xff] %v792_v61  ;;  %v833_v2 = vsel %vm832_vm15, 0.0, %v829_v63  ;;  %v1883_v5 = vld [vmem:[%s842_s21 + $0x8] sm:$0x3f]  ;;  %1878 = vst [vmem:[%s2426_s14 + $0x8] sm:$0x3f] %v800_v1 }
 0x261   : >>> { %v855_v4 = vsel %vm854_vm0, %v850_v55, %v851_v0  ;;  %834 = vst [vmem:[%s822_s20] sm:$0xff] %v833_v2  ;;  %v840_v6 = vsel %vm839_vm1, 0.0, %v1881_v3  ;;  %v863_v7 = vsel %vm862_vm2, %v850_v55, %v1883_v5  ;;  %s2448_s14 = smov [#allocation15] }
 0x262   : >>> { %856 = vst [vmem:[%s842_s21] sm:$0xff] %v855_v4  ;;  %1882 = vst [vmem:[%s822_s20 + $0x8] sm:$0x3f] %v840_v6  ;;  %s2452_s20 = smov [#allocation13] }
 0x263   : >>> { %1884 = vst [vmem:[%s842_s21 + $0x8] sm:$0x3f] %v863_v7  ;;  %s2456_s21 = smov [#allocation14] }
 0x266   : >>> { %v867_v8 = vld [vmem:[%s2437_s28] sm:$0xff]  ;;  %v1885_v15 = vld [vmem:[%s2452_s20 + $0x8] sm:$0x3f] }
 0x267   : >>> { %868 = vrot.lane.b32.xlu1 %v867_v8, %s2067_s30  ;;  %v871_v10 = vld [vmem:[%s2439_s27] sm:$0xff]  ;;  %v1887_v11 = vld [vmem:[%s2443_s17 + $0x8] sm:$0x3f] }
 0x268   : >>> { %872 = vrot.lane.b32.xlu0 %v871_v10, %s2067_s30  ;;  %v1888_v16 = vld [vmem:[%s2452_s20 + $0x8] sm:$0x3f] }
 0x269   : >>> { %v937_v13 = vld [vmem:[%s2446_s29] sm:$0xff]  ;;  %v1893_v17 = vld [vmem:[%s2456_s21 + $0x8] sm:$0x3f] }
 0x26a   : >>> { %v933_v14 = vld [vmem:[%s2448_s14] sm:$0xff]  ;;  %v1891_v18 = vld [vmem:[%s2458_s0 + $0x8] sm:$0x3f] }
 0x26b   : >>> { %904 = vrot.lane.b32.xlu1 %v1887_v11, %s2067_s30  ;;  %v1894_v19 = vld [vmem:[%s2458_s0 + $0x8] sm:$0x3f] }
 0x26c   : >>> { %889 = vrot.lane.b32.xlu0 %v867_v8, %s2068_s11  ;;  %v1886_v26 = vld [vmem:[%s2443_s17 + $0x8] sm:$0x3f] }
 0x26d   : >>> { %v1892_v34 = vld [vmem:[%s2456_s21 + $0x8] sm:$0x3f] }
 0x26f   : >>> { %938 = vrot.lane.b32.xlu1 %v937_v13, %s2067_s30 }
 0x270   : >>> { %934 = vrot.lane.b32.xlu0 %v933_v14, %s2067_s30 }
 0x273   : >>> { %900 = vrot.lane.b32.xlu1 %v1885_v15, %s2067_s30 }
 0x274   : >>> { %921 = vrot.lane.b32.xlu0 %v1888_v16, %s2068_s11 }
 0x277   : >>> { %970 = vrot.lane.b32.xlu1 %v1893_v17, %s2067_s30 }
 0x278   : >>> { %966 = vrot.lane.b32.xlu0 %v1891_v18, %s2067_s30  ;;  %s2508_s30 = smov [#allocation14] }
 0x27b   : >>> { %955 = vrot.lane.b32.xlu1 %v933_v14, %s2068_s11 }
 0x27f   : >>> { %987 = vrot.lane.b32.xlu1 %v1894_v19, %s2068_s11  ;;  %s373_s11 = smov (%p468_p9), [#allocation13] }
 0x2d9   : >>> { %v869_v20 = vpop.permute.xlu1 %868 }
 0x2da   : >>> { %v873_v21 = vpop.permute.xlu0 %872 }
 0x2db   : >>> { %v877_v22 = vsel %vm876_vm3, %v871_v10, %v873_v21 }
 0x2dc   : >>> { %v881_v23 = vsel %vm880_vm5, %v869_v20, %v877_v22 }
 0x2dd   : >>> { %v887_v24 = vsel %vm1673_vm4, %v881_v23, 0.0  ;;  %v905_v25 = vpop.permute.xlu1 %904 }
 0x2de   : >>> { %v890_v27 = vpop.permute.xlu0 %889  ;;  %927 = vst [vmem:[%s2439_s27] sm:$0xff] %v887_v24  ;;  %v909_v35 = vsel %vm876_vm3, %v1887_v11, %v905_v25  ;;  %s2503_s27 = smov [#allocation13] }
 0x2df   : >>> { %v894_v28 = vsel %vm893_vm6, %v871_v10, %v890_v27 }
 0x2e0   : >>> { %928 = vst [vmem:[%s2437_s28] sm:$0xff] %v894_v28  ;;  %s2499_s28 = smov [#allocation12] }
 0x2e1   : >>> { %v939_v29 = vpop.permute.xlu1 %938 }
 0x2e2   : >>> { %v943_v30 = vsel %vm876_vm3, %v937_v13, %v939_v29  ;;  %v935_v31 = vpop.permute.xlu0 %934 }
 0x2e3   : >>> { %v947_v32 = vsel %vm880_vm5, %v935_v31, %v943_v30 }
 0x2e4   : >>> { %v953_v33 = vsel %vm1673_vm4, %v947_v32, 0.0  ;;  %v362_v32 = vadd.s32 (%p468_p9), 8, %v343_v9  ;;  %v395_v9 = vmov (%p468_p9), %v2176_v9 }
 0x2e5   : >>> { %v901_v36 = vpop.permute.xlu1 %900  ;;  %993 = vst [vmem:[%s2446_s29] sm:$0xff] %v953_v33  ;;  %s344_s29 = smov (%p468_p9), [#allocation12]  ;;  %v418_v9 = vmov (%p468_p9), %v2176_v9 }
 0x2e6   : >>> { %v913_v37 = vsel %vm880_vm5, %v901_v36, %v909_v35  ;;  %v922_v38 = vpop.permute.xlu0 %921 }
 0x2e7   : >>> { %v919_v39 = vsel %vm1673_vm4, %v913_v37, 0.0  ;;  %v926_v40 = vsel %vm893_vm6, %v1886_v26, %v922_v38 }
 0x2e8   : >>> { %1889 = vst [vmem:[%s2443_s17 + $0x8] sm:$0x3f] %v919_v39  ;;  %1890 = vst [vmem:[%s2452_s20 + $0x8] sm:$0x3f] %v926_v40  ;;  %s1042_s17 = smov [#allocation15]  ;;  %s419_s20 = smov (%p468_p9), [#allocation15] }
 0x2e9   : >>> { %v971_v41 = vpop.permute.xlu1 %970 }
 0x2ea   : >>> { %v975_v42 = vsel %vm876_vm3, %v1893_v17, %v971_v41  ;;  %v967_v43 = vpop.permute.xlu0 %966 }
 0x2eb   : >>> { %v979_v44 = vsel %vm880_vm5, %v967_v43, %v975_v42 }
 0x2ec   : >>> { %v985_v45 = vsel %vm1673_vm4, %v979_v44, 0.0 }
 0x2ed   : >>> { %v956_v46 = vpop.permute.xlu1 %955  ;;  %1895 = vst [vmem:[%s2456_s21 + $0x8] sm:$0x3f] %v985_v45 }
 0x2ee   : >>> { %v960_v47 = vsel %vm893_vm6, %v937_v13, %v956_v46  ;;  %v439_v46 = vadd.s32 (%p468_p9), 8, %v418_v9 }
 0x2ef   : >>> { %v999_v48 = vld [vmem:[%s2499_s28] ss:$0 sm:$0xff]  ;;  %v1898_v50 = vld [vmem:[%s2499_s28 + $0x7] ss:$0 sm:$0xff]  ;;  %994 = vst [vmem:[%s2448_s14] sm:$0xff] %v960_v47  ;;  %v1899_v52 = vld [vmem:[%s2499_s28 + $0x7] sm:$0x3e] }
 0x2f0   : >>> { %v1897_v49 = vld [vmem:[%s2499_s28 - $0x1] sm:$0xfe]  ;;  %v1017_v55 = vsel %vm1005_vm8, %v1898_v50, %v1899_v52  ;;  %v1908_v57 = vld [vmem:[%s2503_s27 + $0x7] ss:$0 sm:$0xff]  ;;  %v1909_v58 = vld [vmem:[%s2503_s27 + $0x7] sm:$0x3e] }
 0x2f1   : >>> { %v1006_v51 = vsel %vm1005_vm8, %v999_v48, %v1897_v49  ;;  %v1043_v53 = vld [vmem:[%s2503_s27] ss:$0 sm:$0xff]  ;;  %v1910_v59 = vld [vmem:[%s2503_s27 + $0xd] ss:$0 sm:$0xff]  ;;  %v988_v60 = vpop.permute.xlu1 %987  ;;  %v1061_v61 = vsel %vm1005_vm8, %v1908_v57, %v1909_v58  ;;  %s396_s14 = smov (%p468_p9), [#allocation14] }
 0x2f2   : >>> { %v1907_v54 = vld [vmem:[%s2503_s27 - $0x1] sm:$0xfe]  ;;  %1009 = vst [vmem:[%s2499_s28] sm:$0xff] %v1006_v51  ;;  %v992_v62 = vsel %vm893_vm6, %v1892_v34, %v988_v60  ;;  %v1900_v63 = vld [vmem:[%s2499_s28 + $0xd] ss:$0 sm:$0xff]  ;;  %1911 = vst [vmem:[%s2503_s27 + $0x8] sm:$0x3f] %v1061_v61 }
 0x2f3   : >>> { %v1050_v56 = vsel %vm1005_vm8, %v1043_v53, %v1907_v54  ;;  %1896 = vst [vmem:[%s2458_s0 + $0x8] sm:$0x3f] %v992_v62  ;;  %1901 = vst [vmem:[%s2499_s28 + $0x8] sm:$0x3f] %v1017_v55  ;;  %s1235_s0 = sadd.s32 (%p468_p9), 1, %s2060_s25   ;;  %vm363_vm8 = vcmp.eq.s32.totalorder (%p468_p9), %v362_v32, %v340_v12  ;;  %v415_v12 = vmov (%p468_p9), %v2179_v12 }
 0x2f4   : >>> { %1053 = vst [vmem:[%s2503_s27] sm:$0xff] %v1050_v56  ;;  %v1021_v0 = vld [vmem:[%s2508_s30] ss:$0 sm:$0xff]  ;;  %v1903_v1 = vld [vmem:[%s2508_s30 + $0x9] sm:$0x1f]  ;;  %v1904_v2 = vld [vmem:[%s2508_s30 + $0x8] ss:$0 sm:$0xff]  ;;  %s2655_s25 = smov (%p468_p9), %s1235_s0 }
 0x2f5   : >>> { %1902 = vst [vmem:[%s2499_s28 + $0x1] sm:$0x1] %v1021_v0  ;;  %v1030_v3 = vsel %vm1029_vm9, %v1900_v63, %v1903_v1  ;;  %v1906_v4 = vld [vmem:[%s2508_s30 + $0x1] sm:$0x7f]  ;;  %p464_p10 = scmp.ge.s32.totalorder (%p468_p9), %s1235_s0, 15 }
 0x2f6   : >>> { %1905 = vst [vmem:[%s2508_s30 + $0x8] sm:$0x3f] %v1030_v3  ;;  %v1038_v5 = vsel %vm1037_vm10, %v1904_v2, %v1906_v4 }
 0x2f7   : >>> { %1040 = vst [vmem:[%s2508_s30] sm:$0xff] %v1038_v5 }
 0x2f9   : >> { %470 = sbr.rel (!%p468_p9) target bundleno = 289 (0x121), region = 443 }
 0x2fa   : >>> { %v1065_v6 = vld [vmem:[%s1042_s17] ss:$0 sm:$0xff]  ;;  %v1913_v7 = vld [vmem:[%s1042_s17 + $0x9] sm:$0x1f]  ;;  %v1914_v8 = vld [vmem:[%s1042_s17 + $0x8] ss:$0 sm:$0xff] }
 0x2fb   : >>> { %1912 = vst [vmem:[%s2503_s27 + $0x1] sm:$0x1] %v1065_v6  ;;  %v1074_v10 = vsel %vm1029_vm9, %v1910_v59, %v1913_v7  ;;  %v1916_v11 = vld [vmem:[%s1042_s17 + $0x1] sm:$0x7f]  ;;  %vm430_vm9 = vcmp.eq.s32.totalorder (%p468_p9), %v418_v9, %v415_v12 }
 0x2fc   : >>> { %1915 = vst [vmem:[%s1042_s17 + $0x8] sm:$0x3f] %v1074_v10  ;;  %v1082_v13 = vsel %vm1037_vm10, %v1914_v8, %v1916_v11  ;;  %v350_v14 = vld [vmem:[%s344_s29] sm:$0xff] (%p468_p9)  ;;  %v1947_v15 = vld [vmem:[%s344_s29 + $0x8] sm:$0x3f] (%p468_p9)  ;;  %vm440_vm10 = vcmp.eq.s32.totalorder (%p468_p9), %v439_v46, %v415_v12 }
 0x2fd   : >>> { %1084 = vst [vmem:[%s1042_s17] sm:$0xff] %v1082_v13  ;;  %v351_v17 = vsel (%p468_p9), %vm1673_vm4, %v350_v14, 0.0  ;;  %v359_v18 = vsel (%p468_p9), %vm1673_vm4, %v1947_v15, 0.0 }
 0x2fe   : >> { %v402_v21 = vld [vmem:[%s396_s14] sm:$0xff] (%p468_p9)  ;;  %v352_v22 = vmul.f32 (%p468_p9), %v351_v17, %v351_v17  ;;  %v360_v23 = vmul.f32 (%p468_p9), %v359_v18, %v359_v18  ;;  %v1949_v26 = vld [vmem:[%s396_s14 + $0x8] sm:$0x3f] (%p468_p9) }
 0x2ff   : >> { %v403_v27 = vsel (%p468_p9), %vm1673_vm4, %v402_v21, 0.0  ;;  %v409_v31 = vsel (%p468_p9), %vm1673_vm4, %v1949_v26, 0.0 }
 0x300   : >> { %v366_v28 = vadd.f32 %v360_v23, %v352_v22  ;;  %v404_v34 = vmul.f32 %v403_v27, %v403_v27  ;;  %v356_v36 = vsel %vm355_vm7, 0.0, %v352_v22  ;;  %v410_v39 = vmul.f32 %v409_v31, %v409_v31 }
 0x301   : >> { %v364_v40 = vsel %vm363_vm8, 0.0, %v360_v23 }
 0x302   : >> { %v379_v16 = vld [vmem:[%s373_s11] sm:$0xff]  ;;  %v1948_v20 = vld [vmem:[%s373_s11 + $0x8] sm:$0x3f]  ;;  %v365_v42 = vadd.f32 %v364_v40, %v356_v36 }
 0x303   : >> { %v380_v19 = vsel %vm1673_vm4, %v379_v16, 0.0  ;;  %v386_v25 = vsel %vm1673_vm4, %v1948_v20, 0.0 }
 0x304   : >> { %v381_v24 = vmul.f32 %v380_v19, %v380_v19  ;;  %v387_v29 = vmul.f32 %v386_v25, %v386_v25  ;;  %v425_v30 = vld [vmem:[%s419_s20] sm:$0xff]  ;;  %v1950_v35 = vld [vmem:[%s419_s20 + $0x8] sm:$0x3f] }
 0x305   : >> { %v426_v37 = vsel %vm1673_vm4, %v425_v30, 0.0  ;;  %v436_v41 = vsel %vm1673_vm4, %v1950_v35, 0.0 }
 0x306   : >> { %v383_v33 = vadd.f32 %v381_v24, %v366_v28  ;;  %v427_v44 = vmul.f32 %v426_v37, %v426_v37  ;;  %v382_v45 = vadd.f32 %v381_v24, %v365_v42  ;;  %v437_v48 = vmul.f32 %v436_v41, %v436_v41 }
 0x308   : >> { %v389_v38 = vadd.f32 %v387_v29, %v383_v33  ;;  %v388_v49 = vadd.f32 %v387_v29, %v382_v45  ;;  %v431_v53 = vsel %vm430_vm9, 0.0, %v427_v44  ;;  %v441_v55 = vsel %vm440_vm10, 0.0, %v437_v48 }
 0x30a   : >> { %v406_v43 = vadd.f32 %v404_v34, %v389_v38  ;;  %v405_v51 = vadd.f32 %v404_v34, %v388_v49 }
 0x30c   : >> { %v412_v47 = vadd.f32 %v410_v39, %v406_v43  ;;  %v411_v54 = vadd.f32 %v410_v39, %v405_v51 }
 0x30e   : >> { %v433_v50 = vadd.f32 %v427_v44, %v412_v47  ;;  %v432_v56 = vadd.f32 %v431_v53, %v411_v54 }
 0x310   : >> { %v443_v52 = vadd.f32 %v437_v48, %v433_v50  ;;  %v442_v57 = vadd.f32 %v441_v55, %v432_v56 }
 0x312   : >> { %444 = vadd.xlane.f32.xlu0 %v443_v52 }
 0x316   : >> { %452 = vadd.xlane.f32.xlu0 %v442_v57 }
 0x39f   : >> { %v445_v58 = vpop.xlane.xlu0 %444 }
 0x3a0   : >> { %v446_v59 = vrot.slane %v445_v58, 4 }
 0x3a2   : >> { %v447_v60 = vadd.f32 %v446_v59, %v445_v58 }
 0x3a3   : >> { %v453_v62 = vpop.xlane.xlu0 %452 }
 0x3a4   : >> { %v448_v61 = vrot.slane %v447_v60, 2  ;;  %v454_v63 = vrot.slane %v453_v62, 4 }
 0x3a6   : >> { %v455_v0 = vadd.f32 %v454_v63, %v453_v62  ;;  %v449_v1 = vadd.f32 %v448_v61, %v447_v60 }
 0x3a8   : >> { %v456_v2 = vrot.slane %v455_v0, 2  ;;  %v450_v4 = vrot.slane %v449_v1, 1 }
 0x3aa   : >> { %v457_v3 = vadd.f32 %v456_v2, %v455_v0  ;;  %v451_v7 = vadd.f32 %v450_v4, %v449_v1 }
 0x3ac   : >> { %v458_v5 = vrot.slane %v457_v3, 1 }
 0x3ae   : >> { %v459_v6 = vadd.f32 %v458_v5, %v457_v3 }
 0x3b0   : >> { %1971 = vpush %v459_v6 }
 0x3b1   : >> { %1973 = vpush %v451_v7 }
 0x3e1   : >> { %s1972_s26 = spop %1971 }
 0x3e2   : >> { %s1974_s21 = spop %1973 }
 0x3e3   : >> { %s462_s28 = smul.f32 1e-10, %s1974_s21 }
 0x3e5   : >> { %p463_p11 = scmp.le.f32.partialorder %s1972_s26, %s462_s28 }
 0x3e7   : >> { %p465_p12 = por %p464_p10, %p463_p11 }
 0x3e9   : > { %1237 = sbr.rel (!%p465_p12) target bundleno = 288 (0x120), region = 454 }
 0x3f0 PF: > { %s1242_s27 = smov [#allocation12]  ;;  %v1246_v12 = vmov %v2179_v12  ;;  %v1249_v9 = vmov %v2176_v9  ;;  %s1268_s25 = smov [#allocation15] }
 0x3f1   : > { %v1272_v12 = vmov %v2179_v12  ;;  %v1275_v9 = vmov %v2176_v9  ;;  %v1250_v8 = vld [vmem:[%s1242_s27] sm:$0xff]  ;;  %vm1253_vm11 = vcmp.eq.s32.totalorder %v1249_v9, %v1246_v12  ;;  %v1951_v10 = vld [vmem:[%s1242_s27 + $0x8] sm:$0x3f]  ;;  %v1258_v11 = vadd.s32 8, %v1249_v9  ;;  %s1238_s30 = sand.u32 7, %s2135_s12   ;;  %s2656_s29 = scalar_lea.vmem [#allocation5], %s2174_s22 }
 0x3f2   : > { %vm1279_vm12 = vcmp.eq.s32.totalorder %v1275_v9, %v1272_v12  ;;  %v1254_v13 = vsel %vm1253_vm11, %v1250_v8, 0.0  ;;  %v1284_v14 = vadd.s32 8, %v1275_v9  ;;  %v1276_v15 = vld [vmem:[%s1268_s25] sm:$0xff]  ;;  %v1952_v16 = vld [vmem:[%s1268_s25 + $0x8] sm:$0x3f]  ;;  %s1239_s17 = scalar_lea.vmem [#allocation4], %s1238_s30 }
 0x3f3   : > { %vm1259_vm13 = vcmp.eq.s32.totalorder %v1258_v11, %v1246_v12  ;;  %v1280_v18 = vsel %vm1279_vm12, %v1276_v15, 0.0  ;;  %s1243_s17 = smov %s1239_s17  ;;  %s1241_s0 = scalar_lea.vmem [#allocation6], %s1238_s30 }
 0x3f4   : > { %v1260_v17 = vsel %vm1259_vm13, %v1951_v10, %v1254_v13  ;;  %vm1285_vm4 = vcmp.eq.s32.totalorder %v1284_v14, %v1272_v12  ;;  %s1269_s0 = smov %s1241_s0  ;;  %s2657_s11 = scalar_lea.vmem [#allocation7], %s2174_s22 }
 0x3f5   : > { %v1261_v19 = vrot.slane %v1260_v17, 4  ;;  %v1286_v20 = vsel %vm1285_vm4, %v1952_v16, %v1280_v18  ;;  %s1333_s14 = sshrl.u32 (%p2149_p3), %s2135_s12, 3  ;;  %s2658_s20 = scalar_lea.vmem (%p2149_p3), [#allocation5], %s2174_s22 }
 0x3f6   : > { %v1287_v21 = vrot.slane %v1286_v20, 4  ;;  %s1959_s26 = sshll.u32 (%p2149_p3), %s1333_s14, 2 }
 0x3f7   : > { %v1262_v22 = vadd.f32 %v1261_v19, %v1260_v17  ;;  %s1335_s27 = scalar_lea.vmem (%p2149_p3), %s2646_s4, %s1959_s26 }
 0x3f8   : > { %v1288_v23 = vadd.f32 %v1287_v21, %v1286_v20 }
 0x3f9   : > { %v1263_v24 = vrot.slane %v1262_v22, 2 }
 0x3fa   : > { %v1289_v25 = vrot.slane %v1288_v23, 2 }
 0x3fb   : > { %v1264_v26 = vadd.f32 %v1263_v24, %v1262_v22 }
 0x3fc   : > { %v1290_v27 = vadd.f32 %v1289_v25, %v1288_v23 }
 0x3fd   : > { %v1265_v28 = vrot.slane %v1264_v26, 1 }
 0x3fe   : > { %v1291_v9 = vrot.slane %v1290_v27, 1 }
 0x3ff   : > { %v1266_v29 = vadd.f32 %v1265_v28, %v1264_v26 }
 0x400   : > { %v1292_v12 = vadd.f32 %v1291_v9, %v1290_v27 }
 0x401   : > { %1267 = vst [vmem:[%s1243_s17] sm:$0x1] %v1266_v29 }
 0x402   : > { %1293 = vst [vmem:[%s1269_s0] sm:$0x1] %v1292_v12 }
 0x404   : > { %1332 = sbr.rel (!%p2149_p3) target bundleno = 1042 (0x412), region = 114 }
 0x408   : > { %v1297_v30 = vld [vmem:[#allocation4] sm:$0xf] }
 0x409   : > { %1299 = vst [vmem:[%s2656_s29] sm:$0xf] %v1297_v30  ;;  %v1303_v31 = vld [vmem:[#allocation6] sm:$0xf] }
 0x40a   : > { %1305 = vst [vmem:[%s2657_s11] sm:$0xf] %v1303_v31 }
 0x410   : > { %v1351_v32 = vld [vmem:[%s2658_s20] sm:$0xf] }
 0x411   : > { %1352 = vst [vmem:[%s1335_s27] sm:$0xf] %v1351_v32 }
 0x412 PF: > { %1369 = sbr.rel (!%p2149_p3) target bundleno = 1050 (0x41a), region = 148  ;;  %s1370_s25 = sshrl.u32 (%p2149_p3), %s2135_s12, 3 }
 0x413   : > { %s2659_s30 = scalar_lea.vmem (%p2149_p3), [#allocation7], %s2174_s22  ;;  %s1960_s17 = sshll.u32 (%p2149_p3), %s1370_s25, 2 }
 0x414   : > { %s1372_s11 = scalar_lea.vmem (%p2149_p3), %s2647_s5, %s1960_s17 }
 0x418   : > { %v1388_v33 = vld [vmem:[%s2659_s30] sm:$0xf] (%p2149_p3) }
 0x419   : > { %1389 = vst [vmem:[%s1372_s11] sm:$0xf] %v1388_v33 }
 0x41a PF: > { %s1961_s19 = sshll.u32 %s2135_s12, 4  ;;  %v1418_v34 = vld [vmem:[%s2187_s15] sm:$0xff]  ;;  %v1420_v35 = vld [vmem:[%s2187_s15 + $0x8] sm:$0xff] }
 0x41b   : > { %v1439_v36 = vld [vmem:[%s2192_s16] sm:$0xff]  ;;  %s1405_s20 = scalar_lea.vmem %s2648_s6, %s1961_s19  ;;  %s1426_s28 = scalar_lea.vmem %s2649_s7, %s1961_s19  ;;  %v1441_v37 = vld [vmem:[%s2192_s16 + $0x8] sm:$0xff] }
 0x41c   : > { %v1460_v38 = vld [vmem:[%s2197_s23] sm:$0xff]  ;;  %v1462_v39 = vld [vmem:[%s2197_s23 + $0x8] sm:$0xff]  ;;  %1419 = vst [vmem:[%s1405_s20] sm:$0xff] %v1418_v34  ;;  %1421 = vst [vmem:[%s1405_s20 + $0x8] sm:$0xff] %v1420_v35  ;;  %s1447_s15 = scalar_lea.vmem %s2650_s8, %s1961_s19  ;;  %s1468_s17 = scalar_lea.vmem %s2651_s9, %s1961_s19 }
 0x41d   : > { %1440 = vst [vmem:[%s1426_s28] sm:$0xff] %v1439_v36  ;;  %1442 = vst [vmem:[%s1426_s28 + $0x8] sm:$0xff] %v1441_v37  ;;  %v1481_v40 = vld [vmem:[%s2202_s24] sm:$0xff]  ;;  %v1483_v41 = vld [vmem:[%s2202_s24 + $0x8] sm:$0xff] }
 0x41e   : > { %1461 = vst [vmem:[%s1447_s15] sm:$0xff] %v1460_v38  ;;  %1463 = vst [vmem:[%s1447_s15 + $0x8] sm:$0xff] %v1462_v39 }
 0x41f   : > { %1482 = vst [vmem:[%s1468_s17] sm:$0xff] %v1481_v40  ;;  %1484 = vst [vmem:[%s1468_s17 + $0x8] sm:$0xff] %v1483_v41 }
 0x420 PF: > { %p13_p13 = scmp.ge.s32.totalorder %s2138_s13, 6   ;;  %s2660_s30 = smov %s2052_s10 }
 0x421   : > { %s2661_s10 = smov %s2147_s18  ;;  %s2662_s11 = smov %s2138_s13 }
 0x422   :  { %15 = sbr.rel (!%p13_p13) target bundleno = 4 (0x4), region = 465 }

// kernel: _lambda_.3
= control target key start
LH: loop header
LB: loop body
LE: loop exit
PB: predicated region body
PF: predicated region fallthrough
CT: control target
= control target key end

     0   :  { %7 = vsyncpa [#allocation3], 0  ;;  %s896_s0 = inlined_call_operand.hbm [shape: f32[4,1,32,32], index: 0, kind: input, shape index: {}]   ;;  %s897_s1 = inlined_call_operand.hbm [shape: f32[1,1,28,32], index: 1, kind: input, shape index: {}]   ;;  %s898_s2 = inlined_call_operand.vmem [shape: f32[4,1,28,28], index: 2, kind: output, shape index: {}]  }
   0x1   :  { %9 = vsyncpa [#allocation3 + $0x1], 0 }
   0x2   :  { %10 = vsyncpa [#allocation5], 0  ;;  %s726_s9 = smov 0   ;;  %s728_s10 = smov 0  }
   0x3   :  { %s730_s11 = smov 0   ;;  %s732_s12 = smov 0  }
   0x4 LB: > { %s745_s13 = sadd.s32 4294967295, %s705_s12   ;;  %p36_p0 = scmp.ne.s32.totalorder %s697_s10, %s693_s9  ;;  %s705_s12 = sphi %s732_s12, %s915_s12   ;;  %s701_s11 = sphi %s730_s11, %s914_s11   ;;  %s697_s10 = sphi %s728_s10, %s913_s10   ;;  %s693_s9 = sphi %s726_s9, %s912_s9  }
   0x5   : > { %p899_p1 = scmp.eq.s32.totalorder %s745_s13, 0  ;;  %p466_p2 = scmp.ge.s32.totalorder %s705_s12, 1 }
   0x6   : > { %p94_p3 = scmp.lt.s32.totalorder %s705_s12, 5  ;;  %s707_s16 = smov [#allocation4]  }
   0x7   : > { %p753_p4 = por %p899_p1, %p36_p0  ;;  %s106_s17 = sshll.u32 %s707_s16, 4  ;;  %s107_s17 = int_to_ptr.vmem [resolvable:$true] %s106_s17 }
   0x8   : > { %p757_p5 = pnand %p466_p2, %p94_p3  ;;  %s770_s19 = sadd.s32 1, %s705_s12  }
   0x9   : > { %s902_s14 = scalar_select %p753_p4, 1, 0 }
   0xa   : > { %s903_s15 = scalar_select %p757_p5, 1, 0 }
   0xb   : > { %p563_p6 = pneg %p757_p5  ;;  %s23_s20 = sadd.s32 1, %s701_s11 }
   0xc   : > { %s20_s21 = ssub.s32 %s705_s12, %s770_s19  ;;  %s609_s24 = scalar_lea.hbm %s897_s1, 512 }
   0xd   : > { %p765_p7 = pnand %p563_p6, %p899_p1  ;;  %p610_p8 = scmp.ne.s32.totalorder %s897_s1, %s609_s24 }
   0xe   : > { %p616_p12 = scmp.lt.u32.totalorder %s609_s24, %s897_s1 }
   0xf   : > { %p611_p9 = pneg %p765_p7 }
  0x11   : > { %p612_p10 = pnand %p611_p9, %p610_p8 }
  0x13   : > { %p613_p11 = pneg %p612_p10 }
  0x15   : > { %p618_p13 = pnand %p616_p12, %p613_p11 }
  0x17   : > { %621 = shalt.err (!%p618_p13)
}
  0x18   : > { %s622_s29 = scalar_lea.vmem %s107_s17, 512  ;;  %p630_p6 = scmp.lt.s32.totalorder %s107_s17, %s107_s17 }
  0x19   : > { %p623_p0 = scmp.ne.s32.totalorder %s107_s17, %s622_s29  ;;  %p631_p1 = scmp.lt.s32.totalorder %s622_s29, %s622_s29 }
  0x1b   : > { %p625_p2 = pnand %p623_p0, %p611_p9  ;;  %p632_p4 = por %p631_p1, %p630_p6 }
  0x1d   : > { %p626_p3 = pneg %p625_p2 }
  0x1f   : > { %p633_p5 = pnand %p632_p4, %p626_p3 }
  0x21   : > { %636 = shalt.err (!%p633_p5)
}
  0x22   : > { %s708_s30 = smov 128   ;;  %s709_s3 = smov 8  }
  0x23   : > { %566 = dma.hbm_to_vmem [thread:$0]  (!%p765_p7), %s897_s1, 512, %s107_s17, [#allocation5], %s708_s30, %s708_s30, %s709_s3  }
  0x24   : > { %p21_p1 = scmp.eq.s32.totalorder %s20_s21, 0  ;;  %p30_p4 = scmp.ne.s32.totalorder %s701_s11, %s697_s10 }
  0x25   : > { %p31_p5 = scmp.eq.s32.totalorder %s705_s12, 0  ;;  %p572_p8 = scmp.lt.s32.totalorder %s705_s12, 4 }
  0x26   : > { %s799_s6 = scalar_select %p21_p1, %s701_s11, %s23_s20  }
  0x27   : > { %p32_p9 = por %p31_p5, %p30_p4  ;;  %s120_s7 = sand.u32 1, %s701_s11  }
  0x28   : > { %s469_s8 = sshll.u32 %s120_s7, 5  ;;  %s491_s9 = sshll.u32 %s705_s12, 9 }
  0x29   : > { %s806_s18 = scalar_lea.hbm %s896_s0, %s491_s9  ;;  %s124_s17 = scalar_lea.vmem [#allocation2], %s469_s8 }
  0x2a   : > { %s131_s21 = sshll.u32 %s124_s17, 4  ;;  %p810_p7 = pnand %p572_p8, %p32_p9  ;;  %s808_s21 = int_to_ptr.vmem [resolvable:$true] %s131_s21 }
  0x2b   : > { %s814_s12 = scalar_lea.sflag [#allocation3], %s120_s7  ;;  %s637_s23 = scalar_lea.hbm %s806_s18, 512 }
  0x2c   : > { %p638_p10 = scmp.ne.s32.totalorder %s806_s18, %s637_s23  ;;  %p639_p11 = pneg %p810_p7 }
  0x2d   : > { %s642_s26 = scalar_lea.hbm %s896_s0, 2048  ;;  %p643_p0 = scmp.lt.u32.totalorder %s806_s18, %s896_s0 }
  0x2e   : > { %p640_p12 = pnand %p639_p11, %p638_p10  ;;  %p644_p2 = scmp.lt.u32.totalorder %s642_s26, %s637_s23 }
  0x2f   : > { %p646_p6 = scmp.lt.u32.totalorder %s637_s23, %s806_s18 }
  0x30   : > { %p641_p13 = pneg %p640_p12  ;;  %p645_p3 = por %p644_p2, %p643_p0 }
  0x32   : > { %p647_p1 = por %p646_p6, %p645_p3 }
  0x34   : > { %p648_p4 = pnand %p647_p1, %p641_p13 }
  0x36   : > { %651 = shalt.err (!%p648_p4)
}
  0x37   : > { %s652_s29 = scalar_lea.vmem %s808_s21, 512  ;;  %s710_s4 = smov [#allocation2]  }
  0x38   : > { %p653_p5 = scmp.ne.s32.totalorder %s808_s21, %s652_s29  ;;  %s657_s5 = sshll.u32 %s710_s4, 4  ;;  %s658_s5 = int_to_ptr.vmem [resolvable:$false] %s657_s5 }
  0x39   : > { %s659_s7 = scalar_lea.vmem %s658_s5, 1024  ;;  %p660_p10 = scmp.lt.s32.totalorder %s808_s21, %s658_s5 }
  0x3a   : > { %p655_p8 = pnand %p653_p5, %p639_p11  ;;  %p661_p12 = scmp.lt.s32.totalorder %s659_s7, %s652_s29 }
  0x3c   : > { %p656_p9 = pneg %p655_p8  ;;  %p662_p0 = por %p661_p12, %p660_p10 }
  0x3e   : > { %p663_p2 = pnand %p662_p0, %p656_p9 }
  0x40   : > { %666 = shalt.err (!%p663_p2)
}
  0x41   : > { %570 = dma.hbm_to_vmem [thread:$0]  (!%p810_p7), %s806_s18, 512, %s808_s21, %s814_s12, %s708_s30, %s708_s30, %s709_s3  }
  0x42   : > { %p906_p11 = scmp.ne.s32.totalorder %s903_s15, 0 }
  0x43   : > { %s145_s8 = sand.u32 (!%p906_p11), 1, %s697_s10   ;;  %p907_p13 = scmp.ne.s32.totalorder (!%p906_p11), %s902_s14, 0 }
  0x44   : > { %143 = sbr.rel (%p906_p11) target bundleno = 522 (0x20a), region = 28  ;;  %s473_s9 = sshll.u32 (!%p906_p11), %s145_s8, 5 }
  0x45   : > { %s146_s16 = scalar_lea.sflag (!%p906_p11), [#allocation3], %s145_s8  ;;  %s149_s22 = scalar_lea.vmem (!%p906_p11), [#allocation2], %s473_s9 }
  0x4b   : > { %684 = dma.done.wait (%p907_p13), %s146_s16, 512  }
  0x4c   : > { %686 = vsyncadd (%p907_p13), %s146_s16, 4294966784  ;;  %p908_p3 = scmp.eq.s32.totalorder %s745_s13, 0 }
  0x4e   : > { %688 = dma.done.wait (%p908_p3), [#allocation5], 512   ;;  %p909_p6 = pmov %p908_p3 }
  0x4f   : > { %vm187_vm0 = vcmask 261120   ;;  %v179_v1 = vld [vmem:[%s149_s22] sm:$0xff]  ;;  %v180_v2 = vld [vmem:[%s149_s22 + $0x8] sm:$0xff]  ;;  %v181_v3 = vld [vmem:[%s149_s22 + $0x10] sm:$0xff]  ;;  %p174_p7 = scmp.lt.s32.totalorder %s745_s13, 3  ;;  %vm382_vm2 = vcmask 228352  }
  0x50   : > { %690 = vsyncadd (%p909_p6), [#allocation5], 4294966784  ;;  %v537_v4 = vpack.c.bf16 %v180_v2, %v179_v1  ;;  %v182_v5 = vld [vmem:[%s149_s22 + $0x18] sm:$0xff]  ;;  %v183_v6 = vld [vmem:[#allocation4] sm:$0xff]  ;;  %vm386_vm3 = vcmask 224256  }
  0x51   : > { %vm858_vm1 = vmpackc.low %vm187_vm0, %vm187_vm0  ;;  %v184_v7 = vld [vmem:[#allocation4 + $0x8] sm:$0xff]  ;;  %v541_v8 = vpack.c.bf16 %v182_v5, %v181_v3  ;;  %517 = vmatprep.mubr.msk.f32.mxu0 %vm187_vm0, %v183_v6  ;;  %v185_v9 = vld [vmem:[#allocation4 + $0x10] sm:$0xff]  ;;  %s917_s13 = smov (!%p174_p7, %s745_s13), 3 }
  0x52   : > { %v186_v10 = vld [vmem:[#allocation4 + $0x18] sm:$0xf]  ;;  %v545_v11 = vpack.c.bf16 %v184_v7, %v183_v6  ;;  %538 = vmatprep.subr.bf16.mxu0 %v537_v4  ;;  %s492_s14 = sshll.u32 %s917_s13, 5 }
  0x53   : > { %v551_v12 = vpack.c.bf16 %v186_v10, %v185_v9  ;;  %540 = vmatpush3.bf16.msra.mxu0 %v537_v4  ;;  %s178_s3 = scalar_lea.vmem %s898_s2, %s492_s14 }
  0x54   : > { %547 = vmatprep.subr.msk.bf16.mxu1 %vm858_vm1, %v545_v11  ;;  %542 = vmatprep.subr.bf16.mxu0 %v541_v8 }
  0x55   : > { %550 = vmatpush3.bf16.xpose.msk.msra.mxu1 %vm858_vm1, %v545_v11 }
  0x56   : > { %553 = vmatprep.subr.msk.bf16.mxu1 %vm858_vm1, %v551_v12 }
  0x57   : > { %544 = vmatpush3.bf16.msra.mxu0 %v541_v8 }
  0x5a   : > { %518 = vmatmul.mubr.msk.f32.vlgmr.msra.gmra.mrb[0].mxu0 %vm187_vm0, %v184_v7 }
  0x5b   : > { %520 = vmatprep.mubr.msk.f32.mxu0 %vm187_vm0, %v185_v9 }
  0x5d   : > { %556 = vmatpush3.bf16.xpose.msk.msra.mxu1 %vm858_vm1, %v551_v12 }
  0x5e   : > { %521 = vmatmul.mubr.msk.f32.gmra.mrb[2].mxu0 %vm187_vm0, %v186_v10 }
 0x12d   : > { %v519_v13 = vpop.f32.mrb[0].mxu0 }
 0x12e   : > { %v266_v14 = vpop.f32.mrb[1].mxu0 }
 0x12f   : > { %531 = vmatprep.mubr.msk.f32.mxu1 %vm187_vm0, %v266_v14 }
 0x130   : > { %532 = vmatmul.mubr.msk.f32.vlgmr.msra.gmra.mrb[0].mxu1 %vm187_vm0, %v519_v13 }
 0x131   : > { %v522_v15 = vpop.f32.mrb[2].mxu0 }
 0x132   : > { %v276_v16 = vpop.f32.mrb[3].mxu0 }
 0x133   : > { %534 = vmatprep.mubr.msk.f32.mxu1 %vm187_vm0, %v276_v16 }
 0x134   : > { %535 = vmatmul.mubr.msk.f32.gmra.mrb[2].mxu1 %vm187_vm0, %v522_v15 }
 0x203   : > { %v533_v17 = vpop.f32.mrb[0].mxu1 }
 0x204   : > { %384 = vst.msk [vmem:[%s178_s3 + $0x8] sm:$0xff] %vm382_vm2, %v533_v17  ;;  %v363_v18 = vpop.f32.mrb[1].mxu1 }
 0x205   : > { %383 = vst.msk [vmem:[%s178_s3] sm:$0xff] %vm382_vm2, %v363_v18 }
 0x207   : > { %v536_v19 = vpop.f32.mrb[2].mxu1 }
 0x208   : > { %387 = vst.msk [vmem:[%s178_s3 + $0x18] sm:$0xf] %vm386_vm3, %v536_v19  ;;  %v373_v20 = vpop.f32.mrb[3].mxu1 }
 0x209   : > { %385 = vst.msk [vmem:[%s178_s3 + $0x10] sm:$0xff] %vm382_vm2, %v373_v20 }
 0x20a PF: > { %p13_p1 = scmp.ge.s32.totalorder %s770_s19, 6   ;;  %s912_s9 = smov %s697_s10 }
 0x20b   : > { %s913_s10 = smov %s701_s11  ;;  %s914_s11 = smov %s799_s6 }
 0x20c   : > { %s915_s12 = smov %s770_s19  ;;  %15 = sbr.rel (!%p13_p1) target bundleno = 4 (0x4), region = 72 }
 0x213   :  { %409 = vsyncpa [#allocation3], 1 }
 0x214   :  { %411 = vsyncpa [#allocation3 + $0x1], 1 }
 0x215   :  { %412 = vsyncpa [#allocation5], 1 }

// kernel: custom-call.5
= control target key start
LH: loop header
LB: loop body
LE: loop exit
PB: predicated region body
PF: predicated region fallthrough
CT: control target
= control target key end

     0   :  { %s1672_s30 = smov 0   ;;  %s1674_s10 = smov 0   ;;  %s1999_s0 = inlined_call_operand.vmem [shape: f32[4,7,7], index: 0, kind: input, shape index: {}]   ;;  %s2000_s1 = inlined_call_operand.vmem [shape: f32[4,7,7], index: 1, kind: input, shape index: {}]   ;;  %s2001_s2 = inlined_call_operand.vmem [shape: f32[4,7,7], index: 2, kind: input, shape index: {}]   ;;  %s2002_s3 = inlined_call_operand.vmem [shape: f32[4,7,7], index: 3, kind: input, shape index: {}]   ;;  %s2003_s4 = inlined_call_operand.vmem [shape: f32[4,7], index: 4, kind: output, shape index: {0}]   ;;  %s2004_s5 = inlined_call_operand.vmem [shape: f32[4,7], index: 5, kind: output, shape index: {1}]   ;;  %s2005_s6 = inlined_call_operand.vmem [shape: f32[4,7,7], index: 6, kind: output, shape index: {2}]   ;;  %s2006_s7 = inlined_call_operand.vmem [shape: f32[4,7,7], index: 7, kind: output, shape index: {3}]   ;;  %s2007_s8 = inlined_call_operand.vmem [shape: f32[4,7,7], index: 8, kind: output, shape index: {4}]   ;;  %s2008_s9 = inlined_call_operand.vmem [shape: f32[4,7,7], index: 9, kind: output, shape index: {5}]  }
   0x1   :  { %s1676_s11 = smov 0  }
   0x2 LB: > { %s1688_s12 = sadd.s32 4294967295, %s1609_s11   ;;  %s1691_s13 = sadd.s32 1, %s1609_s11   ;;  %s1609_s11 = sphi %s1676_s11, %s2017_s11   ;;  %s1605_s10 = sphi %s1674_s10, %s2016_s10   ;;  %s1601_s30 = sphi %s1672_s30, %s2015_s30  }
   0x3   : > { %s20_s14 = sshrl.u32 %s1609_s11, 3  ;;  %s21_s15 = sshrl.u32 %s1691_s13, 3 }
   0x4   : > { %s22_s16 = ssub.s32 %s20_s14, %s21_s15  ;;  %s25_s17 = sadd.s32 1, %s1605_s10 }
   0x5   : > { %p23_p0 = scmp.eq.s32.totalorder %s22_s16, 0  ;;  %p35_p1 = scmp.ne.s32.totalorder %s1605_s10, %s1601_s30 }
   0x6   : > { %p36_p2 = scmp.eq.s32.totalorder %s1688_s12, 3  ;;  %p1470_p4 = scmp.ge.s32.totalorder %s1609_s11, 4 }
   0x7   : > { %s1700_s18 = scalar_select %p23_p0, %s1605_s10, %s25_s17  }
   0x8   : > { %p1702_p3 = por %p36_p2, %p35_p1  ;;  %86 = sbr.rel (%p1470_p4) target bundleno = 17 (0x11), region = 16 }
   0x9   : > { %2009 = sst [smem:[#allocation25_spill]] %s1700_s18  ;;  %s88_s20 = sand.u32 (!%p1470_p4), 1, %s1609_s11  }
   0xa   : > { %s1472_s21 = sshll.u32 (!%p1470_p4), %s1609_s11, 3  ;;  %s1471_s22 = sshll.u32 (!%p1470_p4), %s88_s20, 3 }
   0xb   : > { %s92_s25 = scalar_lea.vmem (!%p1470_p4), %s1999_s0, %s1472_s21  ;;  %s90_s26 = scalar_lea.vmem (!%p1470_p4), [#allocation0], %s1471_s22 }
   0xc   : > { %v120_v0 = vld [vmem:[%s92_s25] sm:$0xff] (!%p1470_p4)  ;;  %s130_s29 = scalar_lea.vmem (!%p1470_p4), %s2000_s1, %s1472_s21  ;;  %s168_s16 = scalar_lea.vmem (!%p1470_p4), %s2001_s2, %s1472_s21 }
   0xd   : > { %121 = vst [vmem:[%s90_s26] sm:$0xff] (!%p1470_p4), %v120_v0  ;;  %v158_v1 = vld [vmem:[%s130_s29] sm:$0xff] (!%p1470_p4)  ;;  %s128_s17 = scalar_lea.vmem (!%p1470_p4), [#allocation1], %s1471_s22  ;;  %s206_s23 = scalar_lea.vmem (!%p1470_p4), %s2002_s3, %s1472_s21 }
   0xe   : > { %159 = vst [vmem:[%s128_s17] sm:$0xff] (!%p1470_p4), %v158_v1  ;;  %v196_v2 = vld [vmem:[%s168_s16] sm:$0xff] (!%p1470_p4)  ;;  %s166_s24 = scalar_lea.vmem (!%p1470_p4), [#allocation2], %s1471_s22  ;;  %s204_s25 = scalar_lea.vmem (!%p1470_p4), [#allocation3], %s1471_s22 }
   0xf   : > { %197 = vst [vmem:[%s166_s24] sm:$0xff] %v196_v2  ;;  %v234_v3 = vld [vmem:[%s206_s23] sm:$0xff] }
  0x10   : > { %235 = vst [vmem:[%s204_s25] sm:$0xff] %v234_v3 }
  0x11 PF: > { %p1479_p5 = scmp.ge.s32.totalorder %s1609_s11, 1  ;;  %p240_p6 = scmp.lt.s32.totalorder %s1609_s11, 5 }
  0x13   : > { %p241_p7 = pnand %p1479_p5, %p240_p6 }
  0x15   : > { %244 = sbr.rel (%p241_p7) target bundleno = 992 (0x3e0), region = 156 }
  0x1c   : > { %s247_s26 = sand.u32 1, %s1688_s12   ;;  %s281_s27 = sand.u32 1, %s1601_s30   ;;  %v325_v4 = vlaneseq  ;;  %v1619_v11 = vmov 0.0  }
  0x1d   : > { %s1480_s28 = sshll.u32 %s247_s26, 3  ;;  %s1725_s18 = sshll.u32 %s281_s27, 2 }
  0x1e   : > { %v1727_v5 = vand.u32 127, %v325_v4  ;;  %v1729_v6 = vshrl.u32 %v325_v4, 7  ;;  %s249_s21 = scalar_lea.vmem [#allocation0], %s1480_s28  ;;  %s253_s22 = scalar_lea.vmem [#allocation1], %s1480_s28 }
  0x1f   : > { %v309_v7 = vld [vmem:[%s249_s21] sm:$0xff]  ;;  %v312_v8 = vld [vmem:[%s253_s22] sm:$0xff]  ;;  %s257_s29 = scalar_lea.vmem [#allocation2], %s1480_s28  ;;  %s261_s11 = scalar_lea.vmem [#allocation3], %s1480_s28 }
  0x20   : > { %v315_v9 = vld [vmem:[%s257_s29] sm:$0xff]  ;;  %v318_v10 = vld [vmem:[%s261_s11] sm:$0xff]  ;;  %s1731_s14 = scalar_lea.vmem [#allocation8], %s1480_s28  ;;  %s1734_s30 = scalar_lea.vmem [#allocation9], %s1480_s28  ;;  %v327_v5 = vmov %v1727_v5  ;;  %v330_v6 = vmov %v1729_v6  ;;  %vm1359_vm2 = vcmp.lt.s32.totalorder %v1727_v5, 7 }
  0x21   : > { %320 = vst [vmem:[%s1731_s14] sm:$0xff] %v1619_v11  ;;  %321 = vst [vmem:[%s1734_s30] sm:$0xff] %v1619_v11  ;;  %s308_s15 = smov [#allocation12]  ;;  %s311_s16 = smov [#allocation13]  ;;  %v340_v5 = vmov %v1727_v5  ;;  %v343_v6 = vmov %v1729_v6  ;;  %vm334_vm0 = vcmp.eq.s32.totalorder %v330_v6, %v327_v5 }
  0x22   : > { %s1737_s17 = scalar_lea.vmem [#allocation10], %s1480_s28  ;;  %s1740_s20 = scalar_lea.vmem [#allocation11], %s1480_s28  ;;  %310 = vst [vmem:[%s308_s15] sm:$0xff] %v309_v7  ;;  %313 = vst [vmem:[%s311_s16] sm:$0xff] %v312_v8  ;;  %vm347_vm1 = vcmp.eq.s32.totalorder %v343_v6, %v340_v5  ;;  %v1351_v5 = vmov %v1727_v5  ;;  %v1354_v6 = vmov %v1729_v6 }
  0x23   : > { %322 = vst [vmem:[%s1737_s17] sm:$0xff] %v1619_v11  ;;  %323 = vst [vmem:[%s1740_s20] sm:$0xff] %v1619_v11  ;;  %s314_s23 = smov [#allocation14]  ;;  %s317_s24 = smov [#allocation15]  ;;  %vm1364_vm3 = vcmp.eq.s32.totalorder %v1354_v6, %v1351_v5  ;;  %v1402_v5 = vmov %v1727_v5  ;;  %v1371_v6 = vmov %v1729_v6 }
  0x24   : > { %316 = vst [vmem:[%s314_s23] sm:$0xff] %v315_v9  ;;  %319 = vst [vmem:[%s317_s24] sm:$0xff] %v318_v10  ;;  %s324_s14 = smov %s1731_s14  ;;  %s337_s20 = smov %s1740_s20  ;;  %v1368_v5 = vmov %v1727_v5  ;;  %v1405_v6 = vmov %v1729_v6 }
  0x25   : > { %s283_s25 = scalar_lea.vmem [#allocation5], %s1725_s18  ;;  %s1355_s27 = smov [#allocation12]  ;;  %v1385_v5 = vmov %v1727_v5  ;;  %v1388_v6 = vmov %v1729_v6  ;;  %vm1415_vm4 = vcmp.eq.s32.totalorder %v1405_v6, %v1402_v5 }
  0x26   : > { %s1372_s28 = smov [#allocation13]  ;;  %s1389_s21 = smov [#allocation14] }
  0x27   : > { %s1406_s22 = smov [#allocation15] }
  0x28   : > { %v331_v12 = vld [vmem:[%s324_s14] sm:$0x7f] }
  0x29   : > { %v335_v13 = vsel %vm334_vm0, 1.0, %v331_v12  ;;  %v1361_v16 = vld [vmem:[%s1355_s27] sm:$0x7f] }
  0x2a   : > { %v344_v14 = vld [vmem:[%s337_s20] sm:$0x7f]  ;;  %336 = vst [vmem:[%s324_s14] sm:$0x7f] %v335_v13  ;;  %v1362_v18 = vsel %vm1359_vm2, %v1361_v16, 0.0 }
  0x2b   : > { %v348_v15 = vsel %vm347_vm1, 1.0, %v344_v14  ;;  %v1378_v17 = vld [vmem:[%s1372_s28] sm:$0x7f]  ;;  %v1363_v22 = vmul.f32 %v1362_v18, %v1362_v18 }
  0x2c   : > { %349 = vst [vmem:[%s337_s20] sm:$0x7f] %v348_v15  ;;  %v1379_v19 = vsel %vm1359_vm2, %v1378_v17, 0.0  ;;  %v1395_v20 = vld [vmem:[%s1389_s21] sm:$0x7f] }
  0x2d   : > { %v1412_v21 = vld [vmem:[%s1406_s22] sm:$0x7f]  ;;  %v1380_v23 = vmul.f32 %v1379_v19, %v1379_v19  ;;  %v1396_v24 = vsel %vm1359_vm2, %v1395_v20, 0.0  ;;  %v1365_v29 = vsel %vm1364_vm3, 0.0, %v1363_v22 }
  0x2e   : > { %v1413_v25 = vsel %vm1359_vm2, %v1412_v21, 0.0  ;;  %v1397_v26 = vmul.f32 %v1396_v24, %v1396_v24 }
  0x2f   : > { %v1382_v27 = vadd.f32 %v1380_v23, %v1363_v22  ;;  %v1414_v28 = vmul.f32 %v1413_v25, %v1413_v25  ;;  %v1381_v30 = vadd.f32 %v1380_v23, %v1365_v29 }
  0x31   : > { %v1399_v31 = vadd.f32 %v1397_v26, %v1382_v27  ;;  %v1398_v32 = vadd.f32 %v1397_v26, %v1381_v30  ;;  %v1416_v33 = vsel %vm1415_vm4, 0.0, %v1414_v28 }
  0x33   : > { %v1418_v34 = vadd.f32 %v1414_v28, %v1399_v31  ;;  %v1417_v35 = vadd.f32 %v1416_v33, %v1398_v32 }
  0x35   : > { %1419 = vadd.xlane.f32.xlu0 %v1418_v34 }
  0x39   : > { %1427 = vadd.xlane.f32.xlu0 %v1417_v35 }
  0xc2   : > { %v1420_v36 = vpop.xlane.xlu0 %1419 }
  0xc3   : > { %v1421_v37 = vrot.slane %v1420_v36, 4 }
  0xc5   : > { %v1422_v38 = vadd.f32 %v1421_v37, %v1420_v36 }
  0xc6   : > { %v1428_v39 = vpop.xlane.xlu0 %1427 }
  0xc7   : > { %v1423_v40 = vrot.slane %v1422_v38, 2  ;;  %v1429_v41 = vrot.slane %v1428_v39, 4 }
  0xc9   : > { %v1430_v42 = vadd.f32 %v1429_v41, %v1428_v39  ;;  %v1424_v43 = vadd.f32 %v1423_v40, %v1422_v38 }
  0xcb   : > { %v1431_v44 = vrot.slane %v1430_v42, 2  ;;  %v1425_v46 = vrot.slane %v1424_v43, 1 }
  0xcd   : > { %v1432_v45 = vadd.f32 %v1431_v44, %v1430_v42  ;;  %v1426_v49 = vadd.f32 %v1425_v46, %v1424_v43 }
  0xcf   : > { %v1433_v47 = vrot.slane %v1432_v45, 1 }
  0xd1   : > { %v1434_v48 = vadd.f32 %v1433_v47, %v1432_v45 }
  0xd3   : > { %1520 = vpush %v1434_v48 }
  0xd4   : > { %1522 = vpush %v1426_v49 }
 0x104   : > { %s1521_s29 = spop %1520 }
 0x105   : > { %s1523_s11 = spop %1522 }
 0x106   : > { %s1437_s15 = smul.f32 1e-10, %s1523_s11 }
 0x108   : > { %p1438_p8 = scmp.le.f32.partialorder %s1521_s29, %s1437_s15 }
 0x109   : > { %s1769_s16 = smov (!%p1438_p8), 0  }
 0x10a   : > { %1441 = sbr.rel (%p1438_p8) target bundleno = 948 (0x3b4), region = 499 }
 0x111 LB: >> { %s1774_s23 = smov 0   ;;  %s1613_s16 = sphi %s1769_s16, %s2011_s16  }
 0x112 LB: >>> { %s454_s24 = smov [#allocation12]  ;;  %v458_v5 = vmov %v1727_v5  ;;  %v461_v6 = vmov %v1729_v6  ;;  %s474_s27 = smov [#allocation13]  ;;  %vm777_vm14 = vcmp.eq.s32.totalorder %v1729_v6, 0  ;;  %vm789_vm15 = vcmp.eq.s32.totalorder %v1729_v6, 6  ;;  %s1617_s23 = sphi %s1774_s23, %s453_s23  }
 0x113   : >>> { %v478_v5 = vmov %v1727_v5  ;;  %v481_v6 = vmov %v1729_v6  ;;  %v462_v50 = vld [vmem:[%s454_s24] sm:$0x7f]  ;;  %vm465_vm5 = vcmp.eq.s32.totalorder %v461_v6, %v458_v5  ;;  %s494_s28 = smov [#allocation15]  ;;  %s455_s21 = smov [#allocation16] }
 0x114   : >>> { %vm485_vm6 = vcmp.eq.s32.totalorder %v481_v6, %v478_v5  ;;  %v498_v5 = vmov %v1727_v5  ;;  %v501_v6 = vmov %v1729_v6  ;;  %v466_v51 = vsel %vm465_vm5, %v462_v50, 0.0  ;;  %v482_v52 = vld [vmem:[%s474_s27] sm:$0x7f]  ;;  %s475_s22 = smov [#allocation17]  ;;  %s495_s29 = smov [#allocation18] }
 0x115   : >>> { %vm505_vm7 = vcmp.eq.s32.totalorder %v501_v6, %v498_v5  ;;  %v467_v53 = vrot.slane %v466_v51, 4  ;;  %v486_v54 = vsel %vm485_vm6, %v482_v52, 0.0  ;;  %v502_v55 = vld [vmem:[%s494_s28] sm:$0x7f]  ;;  %s518_s11 = smov [#allocation17]  ;;  %s516_s15 = smov [#allocation16]  ;;  %v567_v5 = vmov %v1727_v5 }
 0x116   : >>> { %v487_v56 = vrot.slane %v486_v54, 4  ;;  %v506_v57 = vsel %vm505_vm7, %v502_v55, 0.0  ;;  %s520_s24 = smov [#allocation18]  ;;  %s555_s27 = smov [#allocation19]  ;;  %v570_v6 = vmov %v1729_v6  ;;  %v582_v5 = vmov %v1727_v5 }
 0x117   : >>> { %v468_v58 = vadd.f32 %v467_v53, %v466_v51  ;;  %v507_v59 = vrot.slane %v506_v57, 4  ;;  %s557_s28 = smov [#allocation20]  ;;  %v585_v6 = vmov %v1729_v6  ;;  %vm572_vm12 = vcmp.eq.s32.totalorder %v570_v6, %v567_v5  ;;  %s1798_s14 = smov %s1731_s14 }
 0x118   : >>> { %v488_v60 = vadd.f32 %v487_v56, %v486_v54  ;;  %vm587_vm13 = vcmp.eq.s32.totalorder %v585_v6, %v582_v5  ;;  %s1801_s30 = smov %s1734_s30  ;;  %s1804_s17 = smov %s1737_s17  ;;  %v825_v53 = vld [vmem:[%s1798_s14] sm:$0x7f]  ;;  %v680_v5 = vmov %v1727_v5  ;;  %v683_v6 = vmov %v1729_v6 }
 0x119   : >>> { %v469_v61 = vrot.slane %v468_v58, 2  ;;  %v508_v62 = vadd.f32 %v507_v59, %v506_v57  ;;  %s1809_s20 = smov %s1740_s20  ;;  %v826_v54 = vld [vmem:[%s1801_s30] sm:$0x7f]  ;;  %s819_s26 = smov [#allocation24]  ;;  %v694_v5 = vmov %v1727_v5  ;;  %v697_v6 = vmov %v1729_v6 }
 0x11a   : >>> { %v489_v63 = vrot.slane %v488_v60, 2  ;;  %v827_v55 = vld [vmem:[%s1804_s17] sm:$0x7f]  ;;  %vm687_vm0 = vcmp.eq.s32.totalorder %v683_v6, %v680_v5  ;;  %v653_v5 = vmov %v1727_v5  ;;  %v656_v6 = vmov %v1729_v6  ;;  %s453_s23 = sadd.s32 1, %s1617_s23  }
 0x11b   : >>> { %v470_v0 = vadd.f32 %v469_v61, %v468_v58  ;;  %v509_v1 = vrot.slane %v508_v62, 2  ;;  %v828_v57 = vld [vmem:[%s1809_s20] sm:$0x7f]  ;;  %v667_v5 = vmov %v1727_v5  ;;  %v670_v6 = vmov %v1729_v6  ;;  %p450_p9 = scmp.ge.s32.totalorder %s453_s23, 13  }
 0x11c   : >>> { %v490_v2 = vadd.f32 %v489_v63, %v488_v60  ;;  %vm702_vm1 = vcmp.eq.s32.totalorder %v697_v6, %v694_v5  ;;  %vm661_vm3 = vcmp.eq.s32.totalorder %v656_v6, %v653_v5  ;;  %vm674_vm4 = vcmp.eq.s32.totalorder %v670_v6, %v667_v5 }
 0x11d   : >>> { %v471_v3 = vrot.slane %v470_v0, 1  ;;  %v510_v4 = vadd.f32 %v509_v1, %v508_v62  ;;  %vm716_vm5 = vcmp.eq.s32.totalorder %v1727_v5, 0  ;;  %vm720_vm6 = vcmp.eq.s32.totalorder %v1727_v5, 1 }
 0x11e   : >>> { %v491_v7 = vrot.slane %v490_v2, 1  ;;  %vm733_vm7 = vcmp.eq.s32.totalorder %v1727_v5, 6  ;;  %v354_v5 = vmov (%p450_p9), %v1727_v5  ;;  %v357_v6 = vmov (%p450_p9), %v1729_v6 }
 0x11f   : >>> { %v472_v8 = vadd.f32 %v471_v3, %v470_v0  ;;  %v511_v9 = vrot.slane %v510_v4, 1  ;;  %v407_v5 = vmov (%p450_p9), %v1727_v5 }
 0x120   : >>> { %v492_v10 = vadd.f32 %v491_v7, %v490_v2 }
 0x121   : >>> { %473 = vst [vmem:[%s455_s21] sm:$0x1] %v472_v8  ;;  %v512_v11 = vadd.f32 %v511_v9, %v510_v4  ;;  %s514_s21 = smov [#allocation21] }
 0x122   : >>> { %493 = vst [vmem:[%s475_s22] sm:$0x1] %v492_v10  ;;  %s515_s22 = smov [#allocation22]  ;;  %s559_s21 = smov %s514_s21 }
 0x123   : >>> { %513 = vst [vmem:[%s495_s29] sm:$0x1] %v512_v11  ;;  %s561_s22 = smov %s515_s22  ;;  %s563_s29 = smov [#allocation21] }
 0x128   : >>> { %v517_v14 = vld [vmem:[%s516_s15] sm:$0xff]  ;;  %s576_s15 = smov [#allocation23] }
 0x129   : >>> { %v519_v12 = vld [vmem:[%s518_s11] sm:$0xff]  ;;  %v540_v27 = vand.u32 2147483647, %v517_v14  ;;  %s578_s11 = smov [#allocation22] }
 0x12a   : >>> { %v523_v13 = vmul.f32 2.0, %v519_v12  ;;  %v521_v15 = vld [vmem:[%s520_s24] sm:$0xff]  ;;  %v541_v32 = vand.u32 2147483647, %v519_v12  ;;  %s593_s24 = smov [#allocation23] }
 0x12b   : >>> { %v522_v16 = vsub.f32 %v521_v15, %v517_v14  ;;  %v542_v28 = vand.u32 2147483647, %v521_v15 }
 0x12c   : >>> { %1571 = vrcp.f32 %v523_v13 }
 0x12d   : >>> { %v543_v31 = vmin.f32 %v540_v27, %v542_v28 }
 0x12f   : >>> { %v544_v33 = vmul.f32 1.1920929e-08, %v543_v31 }
 0x131   : >>> { %vm545_vm11 = vcmp.le.f32.partialorder %v541_v32, %v544_v33 }
 0x136   : >>> { %v1572_v17 = vpop.eup %1571 }
 0x137   : >>> { %v525_v18 = vmul.f32 %v1572_v17, %v522_v16 }
 0x139   : >>> { %v527_v19 = vmul.f32 %v525_v18, %v525_v18  ;;  %vm526_vm10 = vcmp.ge.f32.partialorder %v525_v18, 0.0 }
 0x13b   : >>> { %v528_v20 = vadd.f32 1.0, %v527_v19 }
 0x13d   : >>> { %1573 = vrsqrt.f32 %v528_v20  ;;  %vm531_vm8 = vcmp.eq.f32.partialorder %v528_v20, inf  ;;  %v534_v22 = vand.u32 2147483648, %v528_v20  ;;  %vm533_vm9 = vcmp.eq.f32.partialorder %v528_v20, 0.0 }
 0x147   : >>> { %v1574_v21 = vpop.eup %1573 }
 0x148   : >>> { %v530_v23 = vmul.f32 %v1574_v21, %v528_v20 }
 0x14a   : >>> { %v532_v24 = vsel %vm531_vm8, %v528_v20, %v530_v23  ;;  %vm369_vm8 = vcmp.eq.s32.totalorder (%p450_p9), %v357_v6, %v354_v5  ;;  %v410_v6 = vmov (%p450_p9), %v1729_v6  ;;  %v373_v5 = vmov (%p450_p9), %v1727_v5 }
 0x14b   : >>> { %v535_v25 = vsel %vm533_vm9, %v534_v22, %v532_v24  ;;  %v376_v6 = vmov (%p450_p9), %v1729_v6  ;;  %v390_v5 = vmov (%p450_p9), %v1727_v5  ;;  %vm422_vm9 = vcmp.eq.s32.totalorder (%p450_p9), %v410_v6, %v407_v5 }
 0x14c   : >>> { %v536_v26 = vxor.u32 2147483648, %v535_v25  ;;  %v393_v6 = vmov (%p450_p9), %v1729_v6 }
 0x14e   : >>> { %v537_v29 = vsel %vm526_vm10, %v535_v25, %v536_v26 }
 0x14f   : >>> { %v538_v30 = vadd.f32 %v537_v29, %v525_v18 }
 0x151   : >>> { %1575 = vrcp.f32 %v538_v30 }
 0x15b   : >>> { %v1576_v34 = vpop.eup %1575 }
 0x15c   : >>> { %v546_v35 = vsel %vm545_vm11, 0.0, %v1576_v34 }
 0x15d   : >>> { %v547_v36 = vmul.f32 %v546_v35, %v546_v35  ;;  %v551_v37 = vmul.f32 %v546_v35, %v519_v12 }
 0x15f   : >>> { %v548_v38 = vadd.f32 1.0, %v547_v36  ;;  %v552_v39 = vsub.f32 %v517_v14, %v551_v37  ;;  %v554_v40 = vadd.f32 %v551_v37, %v521_v15 }
 0x161   : >>> { %1577 = vrsqrt.f32 %v548_v38  ;;  %556 = vst [vmem:[%s555_s27] sm:$0xff] %v552_v39  ;;  %558 = vst [vmem:[%s557_s28] sm:$0xff] %v554_v40  ;;  %s1789_s27 = smov [#allocation12]  ;;  %s591_s28 = smov [#allocation24] }
 0x162   : >>> { %v601_v49 = vld [vmem:[%s1789_s27] sm:$0x7f] }
 0x16b   : >>> { %v1578_v41 = vpop.eup %1577 }
 0x16c   : >>> { %560 = vst [vmem:[%s559_s21] sm:$0xff] %v1578_v41  ;;  %v550_v42 = vmul.f32 %v1578_v41, %v546_v35  ;;  %s1791_s21 = smov [#allocation13] }
 0x16d   : >>> { %v602_v50 = vld [vmem:[%s1791_s21] sm:$0x7f] }
 0x16e   : >>> { %562 = vst [vmem:[%s561_s22] sm:$0xff] %v550_v42  ;;  %s1793_s22 = smov [#allocation14] }
 0x16f   : >>> { %v603_v51 = vld [vmem:[%s1793_s22] sm:$0x7f] }
 0x173   : >>> { %v564_v43 = vld [vmem:[%s563_s29] ss:$0 sm:$0xff]  ;;  %s1795_s29 = smov [#allocation15] }
 0x174   : >>> { %v573_v44 = vsel %vm572_vm12, %v564_v43, 0.0  ;;  %v604_v52 = vld [vmem:[%s1795_s29] sm:$0x7f] }
 0x175   : >>> { %574 = vadd.xlane.f32.xlu0 %v573_v44  ;;  %v579_v45 = vld [vmem:[%s578_s11] ss:$0 sm:$0xff]  ;;  %s817_s11 = smov [#allocation23] }
 0x176   : >>> { %v588_v46 = vsel %vm587_vm13, %v579_v45, 0.0 }
 0x179   : >>> { %589 = vadd.xlane.f32.xlu0 %v588_v46 }
 0x202   : >>> { %v575_v47 = vpop.xlane.xlu0 %574 }
 0x203   : >>> { %577 = vst [vmem:[%s576_s15] sm:$0xff] %v575_v47  ;;  %s595_s15 = smov [#allocation24] }
 0x206   : >>> { %v590_v48 = vpop.xlane.xlu0 %589 }
 0x207   : >>> { %592 = vst [vmem:[%s591_s28] sm:$0xff] %v590_v48  ;;  %s1825_s28 = smov [#allocation14] }
 0x20a   : >>> { %v594_v56 = vld [vmem:[%s593_s24] sm:$0xff]  ;;  %s623_s24 = smov [#allocation22] }
 0x20b   : >>> { %v818_v58 = vld [vmem:[%s817_s11] sm:$0xff]  ;;  %v605_v59 = vmul.f32 %v601_v49, %v594_v56  ;;  %v608_v60 = vmul.f32 %v602_v50, %v594_v56  ;;  %v612_v61 = vmul.f32 %v603_v51, %v594_v56  ;;  %v615_v62 = vmul.f32 %v604_v52, %v594_v56  ;;  %s1827_s11 = smov [#allocation15] }
 0x20c   : >>> { %v829_v63 = vmul.f32 %v825_v53, %v818_v58  ;;  %v832_v0 = vmul.f32 %v826_v54, %v818_v58  ;;  %v836_v1 = vmul.f32 %v827_v55, %v818_v58  ;;  %v839_v2 = vmul.f32 %v828_v57, %v818_v58  ;;  %v624_v24 = vld [vmem:[%s623_s24] ss:$0 sm:$0xff]  ;;  %s649_s24 = smov [#allocation12] }
 0x20e   : >>> { %v596_v3 = vld [vmem:[%s595_s15] sm:$0xff]  ;;  %s1829_s15 = smov [#allocation12] }
 0x20f   : >>> { %v820_v4 = vld [vmem:[%s819_s26] sm:$0xff]  ;;  %v606_v7 = vmul.f32 %v603_v51, %v596_v3  ;;  %v609_v8 = vmul.f32 %v604_v52, %v596_v3  ;;  %v611_v9 = vmul.f32 %v601_v49, %v596_v3  ;;  %v614_v10 = vmul.f32 %v602_v50, %v596_v3  ;;  %s621_s26 = smov [#allocation21] }
 0x210   : >>> { %v830_v11 = vmul.f32 %v827_v55, %v820_v4  ;;  %v833_v12 = vmul.f32 %v828_v57, %v820_v4  ;;  %v835_v13 = vmul.f32 %v825_v53, %v820_v4  ;;  %v838_v14 = vmul.f32 %v826_v54, %v820_v4  ;;  %v622_v23 = vld [vmem:[%s621_s26] ss:$0 sm:$0xff]  ;;  %s650_s26 = smov [#allocation19] }
 0x211   : >>> { %v607_v15 = vsub.f32 %v605_v59, %v606_v7  ;;  %v610_v16 = vsub.f32 %v608_v60, %v609_v8  ;;  %v613_v17 = vadd.f32 %v612_v61, %v611_v9  ;;  %v616_v18 = vadd.f32 %v615_v62, %v614_v10  ;;  %v657_v59 = vld [vmem:[%s650_s26] ss:$0 sm:$0xff]  ;;  %s769_s26 = smov [#allocation12] }
 0x212   : >>> { %v831_v19 = vsub.f32 %v829_v63, %v830_v11  ;;  %v834_v20 = vsub.f32 %v832_v0, %v833_v12  ;;  %v837_v21 = vadd.f32 %v836_v1, %v835_v13  ;;  %v840_v22 = vadd.f32 %v839_v2, %v838_v14 }
 0x213   : >>> { %618 = vst [vmem:[%s1791_s21] sm:$0x7f] %v610_v16  ;;  %620 = vst [vmem:[%s1795_s29] sm:$0x7f] %v616_v18  ;;  %s691_s21 = smov [#allocation20]  ;;  %s690_s29 = smov [#allocation15] }
 0x214   : >>> { %617 = vst [vmem:[%s1789_s27] sm:$0x7f] %v607_v15  ;;  %619 = vst [vmem:[%s1793_s22] sm:$0x7f] %v613_v17  ;;  %s1842_s27 = smov [#allocation13]  ;;  %s677_s22 = smov [#allocation14]  ;;  %v698_v55 = vld [vmem:[%s691_s21] ss:$0 sm:$0xff] }
 0x215   : >>> { %841 = vst [vmem:[%s1798_s14] sm:$0x7f] %v831_v19  ;;  %842 = vst [vmem:[%s1801_s30] sm:$0x7f] %v834_v20  ;;  %s1832_s14 = smov %s1731_s14  ;;  %s1840_s30 = smov %s1734_s30 }
 0x216   : >>> { %843 = vst [vmem:[%s1804_s17] sm:$0x7f] %v837_v21  ;;  %844 = vst [vmem:[%s1809_s20] sm:$0x7f] %v840_v22  ;;  %s1835_s17 = smov %s1737_s17  ;;  %s1845_s20 = smov %s1740_s20 }
 0x217   : >>> { %s706_s21 = smov [#allocation13] }
 0x21a   : >>> { %v632_v26 = vld [vmem:[%s1827_s11] sm:$0x7f] }
 0x21b   : >>> { %v631_v25 = vld [vmem:[%s1825_s28] sm:$0x7f]  ;;  %v640_v32 = vmul.f32 %v632_v26, %v624_v24  ;;  %v643_v38 = vmul.f32 %v632_v26, %v622_v23 }
 0x21c   : >>> { %v629_v27 = vld [vmem:[%s1829_s15] sm:$0x7f]  ;;  %v639_v31 = vmul.f32 %v631_v25, %v622_v23  ;;  %v642_v33 = vmul.f32 %v631_v25, %v624_v24 }
 0x21d   : >>> { %v847_v28 = vld [vmem:[%s1832_s14] ss:$0 sm:$0xff]  ;;  %v1499_v30 = vld [vmem:[%s1832_s14 + $0x6] ss:$0 sm:$0xff]  ;;  %v633_v44 = vmul.f32 %v629_v27, %v622_v23  ;;  %v636_v45 = vmul.f32 %v629_v27, %v624_v24 }
 0x21e   : >>> { %v1498_v29 = vld [vmem:[%s1832_s14 - $0x1] sm:$0x7e]  ;;  %v1503_v41 = vld [vmem:[%s1840_s30 + $0x6] ss:$0 sm:$0xff]  ;;  %v641_v43 = vsub.f32 %v639_v31, %v640_v32  ;;  %v644_v49 = vadd.f32 %v643_v38, %v642_v33 }
 0x21f   : >>> { %v854_v34 = vsel %vm777_vm14, %v847_v28, %v1498_v29  ;;  %v858_v35 = vld [vmem:[%s1835_s17] ss:$0 sm:$0xff]  ;;  %v1501_v36 = vld [vmem:[%s1835_s17 + $0x1] sm:$0x3f] }
 0x220   : >>> { %v871_v37 = vld [vmem:[%s1840_s30] ss:$0 sm:$0xff]  ;;  %857 = vst [vmem:[%s1832_s14] sm:$0x7f] %v854_v34  ;;  %v866_v39 = vsel %vm789_vm15, %v1499_v30, %v1501_v36  ;;  %v1505_v47 = vld [vmem:[%s1845_s20 + $0x1] sm:$0x3f]  ;;  %647 = vst [vmem:[%s1825_s28] sm:$0x7f] %v641_v43 }
 0x221   : >>> { %v1502_v40 = vld [vmem:[%s1840_s30 - $0x1] sm:$0x7e]  ;;  %1500 = vst [vmem:[%s1832_s14 + $0x1] sm:$0x1] %v858_v35  ;;  %868 = vst [vmem:[%s1835_s17] sm:$0x7f] %v866_v39  ;;  %v890_v50 = vsel %vm789_vm15, %v1503_v41, %v1505_v47  ;;  %s664_s28 = smov [#allocation13] }
 0x222   : >>> { %v882_v42 = vld [vmem:[%s1845_s20] ss:$0 sm:$0xff]  ;;  %v878_v46 = vsel %vm777_vm14, %v871_v37, %v1502_v40  ;;  %648 = vst [vmem:[%s1827_s11] sm:$0x7f] %v644_v49  ;;  %s1887_s11 = smov [#allocation14] }
 0x223   : >>> { %v630_v48 = vld [vmem:[%s1842_s27] sm:$0x7f]  ;;  %881 = vst [vmem:[%s1840_s30] sm:$0x7f] %v878_v46  ;;  %892 = vst [vmem:[%s1845_s20] sm:$0x7f] %v890_v50 }
 0x224   : >>> { %v634_v51 = vmul.f32 %v630_v48, %v624_v24  ;;  %v637_v52 = vmul.f32 %v630_v48, %v622_v23  ;;  %1504 = vst [vmem:[%s1840_s30 + $0x1] sm:$0x1] %v882_v42 }
 0x226   : >>> { %v635_v53 = vsub.f32 %v633_v44, %v634_v51  ;;  %v638_v54 = vadd.f32 %v637_v52, %v636_v45 }
 0x227   : >>> { %v684_v56 = vld [vmem:[%s677_s22] sm:$0x7f] }
 0x228   : >>> { %645 = vst [vmem:[%s1829_s15] sm:$0x7f] %v635_v53  ;;  %646 = vst [vmem:[%s1842_s27] sm:$0x7f] %v638_v54  ;;  %v688_v57 = vsel %vm687_vm0, 0.0, %v684_v56  ;;  %s1620_s15 = smov 1   ;;  %s705_s27 = smov [#allocation12] }
 0x229   : >>> { %v699_v58 = vld [vmem:[%s690_s29] sm:$0x7f]  ;;  %689 = vst [vmem:[%s677_s22] sm:$0x7f] %v688_v57  ;;  %s1621_s22 = smov 127  }
 0x22a   : >>> { %v703_v60 = vsel %vm702_vm1, %v698_v55, %v699_v58 }
 0x22b   : >>> { %704 = vst [vmem:[%s690_s29] sm:$0x7f] %v703_v60  ;;  %s1890_s29 = smov [#allocation15] }
 0x22f   : >>> { %v658_v61 = vld [vmem:[%s649_s24] sm:$0x7f] }
 0x230   : >>> { %v671_v62 = vld [vmem:[%s664_s28] sm:$0x7f]  ;;  %v662_v63 = vsel %vm661_vm3, %v657_v59, %v658_v61 }
 0x231   : >>> { %v675_v0 = vsel %vm674_vm4, 0.0, %v671_v62  ;;  %663 = vst [vmem:[%s649_s24] sm:$0x7f] %v662_v63  ;;  %v743_v1 = vld [vmem:[%s1887_s11] sm:$0x7f]  ;;  %s793_s24 = smov [#allocation13] }
 0x232   : >>> { %676 = vst [vmem:[%s664_s28] sm:$0x7f] %v675_v0  ;;  %744 = vrot.lane.b32.xlu0 %v743_v1, %s1620_s15  ;;  %v739_v7 = vld [vmem:[%s1890_s29] sm:$0x7f]  ;;  %s770_s28 = smov [#allocation14] }
 0x233   : >>> { %v760_v8 = vld [vmem:[%s1890_s29] sm:$0x7f] }
 0x234   : >>> { %v742_v26 = vld [vmem:[%s1887_s11] sm:$0x7f] }
 0x238   : >>> { %v711_v2 = vld [vmem:[%s705_s27] sm:$0x7f] }
 0x239   : >>> { %712 = vrot.lane.b32.xlu1 %v711_v2, %s1620_s15  ;;  %v707_v3 = vld [vmem:[%s706_s21] sm:$0x7f] }
 0x23a   : >>> { %v728_v4 = vld [vmem:[%s706_s21] sm:$0x7f] }
 0x23b   : >>> { %v710_v14 = vld [vmem:[%s705_s27] sm:$0x7f] }
 0x23d   : >>> { %708 = vrot.lane.b32.xlu1 %v707_v3, %s1620_s15 }
 0x241   : >>> { %729 = vrot.lane.b32.xlu1 %v728_v4, %s1621_s22 }
 0x245   : >>> { %740 = vrot.lane.b32.xlu1 %v739_v7, %s1620_s15  ;;  %s794_s15 = smov [#allocation15] }
 0x249   : >>> { %761 = vrot.lane.b32.xlu1 %v760_v8, %s1621_s22  ;;  %s394_s22 = smov (%p450_p9), [#allocation14] }
 0x2a4   : >>> { %v745_v16 = vpop.permute.xlu0 %744 }
 0x2a5   : >>> { %v749_v18 = vsel %vm716_vm5, %v743_v1, %v745_v16 }
 0x2ab   : >>> { %v713_v9 = vpop.permute.xlu1 %712 }
 0x2ac   : >>> { %v717_v10 = vsel %vm716_vm5, %v711_v2, %v713_v9 }
 0x2af   : >>> { %v709_v11 = vpop.permute.xlu1 %708 }
 0x2b0   : >>> { %v721_v12 = vsel %vm720_vm6, %v709_v11, %v717_v10 }
 0x2b1   : >>> { %v727_v13 = vsel %vm1359_vm2, %v721_v12, 0.0 }
 0x2b2   : >>> { %735 = vst [vmem:[%s705_s27] sm:$0x7f] %v727_v13  ;;  %s358_s27 = smov (%p450_p9), [#allocation12] }
 0x2b3   : >>> { %v730_v15 = vpop.permute.xlu1 %729 }
 0x2b4   : >>> { %v734_v17 = vsel %vm733_vm7, %v710_v14, %v730_v15 }
 0x2b5   : >>> { %736 = vst [vmem:[%s706_s21] sm:$0x7f] %v734_v17  ;;  %s377_s21 = smov (%p450_p9), [#allocation13] }
 0x2b7   : >>> { %v741_v19 = vpop.permute.xlu1 %740 }
 0x2b8   : >>> { %v753_v20 = vsel %vm720_vm6, %v741_v19, %v749_v18 }
 0x2b9   : >>> { %v771_v21 = vld [vmem:[%s769_s26] ss:$0 sm:$0xff]  ;;  %v1491_v23 = vld [vmem:[%s769_s26 + $0x6] ss:$0 sm:$0xff]  ;;  %v759_v25 = vsel %vm1359_vm2, %v753_v20, 0.0 }
 0x2ba   : >>> { %v1490_v22 = vld [vmem:[%s769_s26 - $0x1] sm:$0x7e]  ;;  %767 = vst [vmem:[%s1887_s11] sm:$0x7f] %v759_v25  ;;  %s893_s11 = sadd.s32 (%p450_p9), 1, %s1613_s16  }
 0x2bb   : >>> { %v778_v24 = vsel %vm777_vm14, %v771_v21, %v1490_v22  ;;  %v762_v27 = vpop.permute.xlu1 %761  ;;  %p446_p10 = scmp.ge.s32.totalorder (%p450_p9), %s893_s11, 15  ;;  %s2011_s16 = smov (%p450_p9), %s893_s11 }
 0x2bc   : >>> { %781 = vst [vmem:[%s769_s26] sm:$0x7f] %v778_v24  ;;  %v795_v28 = vld [vmem:[%s793_s24] ss:$0 sm:$0xff]  ;;  %v1495_v30 = vld [vmem:[%s793_s24 + $0x6] ss:$0 sm:$0xff]  ;;  %v766_v31 = vsel %vm733_vm7, %v742_v26, %v762_v27 }
 0x2bd   : >>> { %v1494_v29 = vld [vmem:[%s793_s24 - $0x1] sm:$0x7e]  ;;  %768 = vst [vmem:[%s1890_s29] sm:$0x7f] %v766_v31  ;;  %s411_s29 = smov (%p450_p9), [#allocation15] }
 0x2be   : >>> { %v802_v32 = vsel %vm777_vm14, %v795_v28, %v1494_v29 }
 0x2bf   : >>> { %805 = vst [vmem:[%s793_s24] sm:$0x7f] %v802_v32 }
 0x2c1   : >>> { %v782_v33 = vld [vmem:[%s770_s28] ss:$0 sm:$0xff]  ;;  %v1493_v34 = vld [vmem:[%s770_s28 + $0x1] sm:$0x3f] }
 0x2c2   : >>> { %1492 = vst [vmem:[%s769_s26 + $0x1] sm:$0x1] %v782_v33  ;;  %v790_v35 = vsel %vm789_vm15, %v1491_v23, %v1493_v34  ;;  %452 = sbr.rel (!%p450_p9) target bundleno = 274 (0x112), region = 494 }
 0x2c3   : >>> { %792 = vst [vmem:[%s770_s28] sm:$0x7f] %v790_v35 }
 0x2c4   : >>> { %v806_v36 = vld [vmem:[%s794_s15] ss:$0 sm:$0xff]  ;;  %v1497_v37 = vld [vmem:[%s794_s15 + $0x1] sm:$0x3f] }
 0x2c5   : >>> { %1496 = vst [vmem:[%s793_s24 + $0x1] sm:$0x1] %v806_v36  ;;  %v814_v38 = vsel %vm789_vm15, %v1495_v30, %v1497_v37 }
 0x2c6   : >>> { %816 = vst [vmem:[%s794_s15] sm:$0x7f] %v814_v38 }
 0x2c9   : >> { %v364_v39 = vld [vmem:[%s358_s27] sm:$0x7f] }
 0x2ca   : >> { %v365_v41 = vsel %vm1359_vm2, %v364_v39, 0.0  ;;  %v400_v43 = vld [vmem:[%s394_s22] sm:$0x7f] }
 0x2cb   : >> { %v366_v45 = vmul.f32 %v365_v41, %v365_v41  ;;  %v401_v47 = vsel %vm1359_vm2, %v400_v43, 0.0 }
 0x2cc   : >> { %v383_v40 = vld [vmem:[%s377_s21] sm:$0x7f]  ;;  %v402_v49 = vmul.f32 %v401_v47, %v401_v47 }
 0x2cd   : >> { %v384_v42 = vsel %vm1359_vm2, %v383_v40, 0.0  ;;  %v417_v44 = vld [vmem:[%s411_s29] sm:$0x7f]  ;;  %v370_v52 = vsel %vm369_vm8, 0.0, %v366_v45 }
 0x2ce   : >> { %v385_v46 = vmul.f32 %v384_v42, %v384_v42  ;;  %v418_v48 = vsel %vm1359_vm2, %v417_v44, 0.0 }
 0x2cf   : >> { %v419_v51 = vmul.f32 %v418_v48, %v418_v48 }
 0x2d0   : >> { %v387_v50 = vadd.f32 %v385_v46, %v366_v45  ;;  %v386_v53 = vadd.f32 %v385_v46, %v370_v52 }
 0x2d1   : >> { %v423_v56 = vsel %vm422_vm9, 0.0, %v419_v51 }
 0x2d2   : >> { %v404_v54 = vadd.f32 %v402_v49, %v387_v50  ;;  %v403_v55 = vadd.f32 %v402_v49, %v386_v53 }
 0x2d4   : >> { %v425_v57 = vadd.f32 %v419_v51, %v404_v54  ;;  %v424_v58 = vadd.f32 %v423_v56, %v403_v55 }
 0x2d6   : >> { %426 = vadd.xlane.f32.xlu0 %v425_v57 }
 0x2da   : >> { %434 = vadd.xlane.f32.xlu0 %v424_v58 }
 0x363   : >> { %v427_v59 = vpop.xlane.xlu0 %426 }
 0x364   : >> { %v428_v60 = vrot.slane %v427_v59, 4 }
 0x366   : >> { %v429_v61 = vadd.f32 %v428_v60, %v427_v59 }
 0x367   : >> { %v435_v62 = vpop.xlane.xlu0 %434 }
 0x368   : >> { %v430_v63 = vrot.slane %v429_v61, 2  ;;  %v436_v0 = vrot.slane %v435_v62, 4 }
 0x36a   : >> { %v437_v1 = vadd.f32 %v436_v0, %v435_v62  ;;  %v431_v2 = vadd.f32 %v430_v63, %v429_v61 }
 0x36c   : >> { %v438_v3 = vrot.slane %v437_v1, 2  ;;  %v432_v7 = vrot.slane %v431_v2, 1 }
 0x36e   : >> { %v439_v4 = vadd.f32 %v438_v3, %v437_v1  ;;  %v433_v10 = vadd.f32 %v432_v7, %v431_v2 }
 0x370   : >> { %v440_v8 = vrot.slane %v439_v4, 1 }
 0x372   : >> { %v441_v9 = vadd.f32 %v440_v8, %v439_v4 }
 0x374   : >> { %1524 = vpush %v441_v9 }
 0x375   : >> { %1526 = vpush %v433_v10 }
 0x3a5   : >> { %s1525_s23 = spop %1524 }
 0x3a6   : >> { %s1527_s26 = spop %1526 }
 0x3a7   : >> { %s444_s24 = smul.f32 1e-10, %s1527_s26 }
 0x3a9   : >> { %p445_p11 = scmp.le.f32.partialorder %s1525_s23, %s444_s24 }
 0x3ab   : >> { %p447_p12 = por %p446_p10, %p445_p11 }
 0x3ad   : > { %895 = sbr.rel (!%p447_p12) target bundleno = 273 (0x111), region = 505 }
 0x3b4 PF: > { %s900_s28 = smov [#allocation12]  ;;  %v904_v5 = vmov %v1727_v5  ;;  %v907_v6 = vmov %v1729_v6  ;;  %s920_s15 = smov [#allocation15] }
 0x3b5   : > { %v924_v5 = vmov %v1727_v5  ;;  %v927_v6 = vmov %v1729_v6  ;;  %v908_v11 = vld [vmem:[%s900_s28] sm:$0x7f]  ;;  %vm911_vm10 = vcmp.eq.s32.totalorder %v907_v6, %v904_v5  ;;  %s896_s16 = sand.u32 7, %s1688_s12   ;;  %s2012_s21 = scalar_lea.vmem [#allocation7], %s1725_s18 }
 0x3b6   : > { %vm931_vm11 = vcmp.eq.s32.totalorder %v927_v6, %v924_v5  ;;  %v912_v12 = vsel %vm911_vm10, %v908_v11, 0.0  ;;  %v928_v14 = vld [vmem:[%s920_s15] sm:$0x7f]  ;;  %s897_s11 = scalar_lea.vmem [#allocation4], %s896_s16  ;;  %s899_s27 = scalar_lea.vmem [#allocation6], %s896_s16 }
 0x3b7   : > { %v913_v13 = vrot.slane %v912_v12, 4  ;;  %v932_v15 = vsel %vm931_vm11, %v928_v14, 0.0  ;;  %s901_s11 = smov %s897_s11  ;;  %s921_s27 = smov %s899_s27 }
 0x3b8   : > { %v933_v17 = vrot.slane %v932_v15, 4  ;;  %s979_s22 = sshrl.u32 (%p1702_p3), %s1688_s12, 3 }
 0x3b9   : > { %v914_v16 = vadd.f32 %v913_v13, %v912_v12  ;;  %s1512_s29 = sshll.u32 (%p1702_p3), %s979_s22, 2 }
 0x3ba   : > { %v934_v19 = vadd.f32 %v933_v17, %v932_v15  ;;  %s981_s24 = scalar_lea.vmem (%p1702_p3), %s2003_s4, %s1512_s29 }
 0x3bb   : > { %v915_v18 = vrot.slane %v914_v16, 2 }
 0x3bc   : > { %v935_v21 = vrot.slane %v934_v19, 2 }
 0x3bd   : > { %v916_v20 = vadd.f32 %v915_v18, %v914_v16 }
 0x3be   : > { %v936_v23 = vadd.f32 %v935_v21, %v934_v19 }
 0x3bf   : > { %v917_v22 = vrot.slane %v916_v20, 1 }
 0x3c0   : > { %v937_v5 = vrot.slane %v936_v23, 1 }
 0x3c1   : > { %v918_v24 = vadd.f32 %v917_v22, %v916_v20 }
 0x3c2   : > { %v938_v6 = vadd.f32 %v937_v5, %v936_v23 }
 0x3c3   : > { %919 = vst [vmem:[%s901_s11] sm:$0x1] %v918_v24 }
 0x3c4   : > { %939 = vst [vmem:[%s921_s27] sm:$0x1] %v938_v6 }
 0x3c6   : > { %978 = sbr.rel (!%p1702_p3) target bundleno = 980 (0x3d4), region = 174 }
 0x3ca   : > { %v943_v25 = vld [vmem:[#allocation4] sm:$0xf] }
 0x3cb   : > { %945 = vst [vmem:[%s283_s25] sm:$0xf] %v943_v25  ;;  %v949_v26 = vld [vmem:[#allocation6] sm:$0xf] }
 0x3cc   : > { %951 = vst [vmem:[%s2012_s21] sm:$0xf] %v949_v26 }
 0x3d2   : > { %v997_v27 = vld [vmem:[%s283_s25] sm:$0xf] }
 0x3d3   : > { %998 = vst [vmem:[%s981_s24] sm:$0xf] %v997_v27 }
 0x3d4 PF: > { %1015 = sbr.rel (!%p1702_p3) target bundleno = 988 (0x3dc), region = 208  ;;  %s1016_s28 = sshrl.u32 (%p1702_p3), %s1688_s12, 3 }
 0x3d5   : > { %s2013_s15 = scalar_lea.vmem (%p1702_p3), [#allocation7], %s1725_s18  ;;  %s1513_s16 = sshll.u32 (%p1702_p3), %s1016_s28, 2 }
 0x3d6   : > { %s1018_s25 = scalar_lea.vmem (%p1702_p3), %s2004_s5, %s1513_s16 }
 0x3da   : > { %v1034_v28 = vld [vmem:[%s2013_s15] sm:$0xf] (%p1702_p3) }
 0x3db   : > { %1035 = vst [vmem:[%s1018_s25] sm:$0xf] %v1034_v28 }
 0x3dc PF: > { %s1514_s21 = sshll.u32 %s1688_s12, 3  ;;  %v1079_v29 = vld [vmem:[%s1731_s14] sm:$0xff]  ;;  %v1113_v30 = vld [vmem:[%s1734_s30] sm:$0xff] }
 0x3dd   : > { %v1147_v31 = vld [vmem:[%s1737_s17] sm:$0xff]  ;;  %s1051_s18 = scalar_lea.vmem %s2005_s6, %s1514_s21  ;;  %s1085_s26 = scalar_lea.vmem %s2006_s7, %s1514_s21  ;;  %v1181_v32 = vld [vmem:[%s1740_s20] sm:$0xff] }
 0x3de   : > { %1080 = vst [vmem:[%s1051_s18] sm:$0xff] %v1079_v29  ;;  %1114 = vst [vmem:[%s1085_s26] sm:$0xff] %v1113_v30  ;;  %s1119_s15 = scalar_lea.vmem %s2007_s8, %s1514_s21  ;;  %s1153_s14 = scalar_lea.vmem %s2008_s9, %s1514_s21 }
 0x3df   : > { %1148 = vst [vmem:[%s1119_s15] sm:$0xff] %v1147_v31  ;;  %1182 = vst [vmem:[%s1153_s14] sm:$0xff] %v1181_v32 }
 0x3e0 PF: > { %s2014_s17 = sld [smem:[#allocation25_spill]]  ;;  %p13_p13 = scmp.ge.s32.totalorder %s1691_s13, 6  }
 0x3e1   : > { %s2015_s30 = smov %s1605_s10  ;;  %s2017_s11 = smov %s1691_s13 }
 0x3e2   :  { %15 = sbr.rel (!%p13_p13) target bundleno = 2 (0x2), region = 516 }
 0x3e6   : > { %s2016_s10 = smov %s2014_s17 }

// kernel: _lambda_.4
= control target key start
LH: loop header
LB: loop body
LE: loop exit
PB: predicated region body
PF: predicated region fallthrough
CT: control target
= control target key end

     0   :  { %s544_s12 = smov 0   ;;  %s581_s0 = inlined_call_operand.vmem [shape: f32[4,1,28,28], index: 0, kind: input, shape index: {}]   ;;  %s582_s1 = inlined_call_operand.vmem [shape: f32[4,1,1,28], index: 1, kind: input, shape index: {}]   ;;  %s583_s2 = inlined_call_operand.vmem [shape: f32[1,1,14,28], index: 2, kind: input, shape index: {}]   ;;  %s584_s3 = inlined_call_operand.vmem [shape: f32[4,1,14,14], index: 3, kind: output, shape index: {}]  }
   0x1 LB: > { %s442_s13 = sadd.s32 4294967295, %s521_s12   ;;  %p446_p0 = scmp.ge.s32.totalorder %s521_s12, 1  ;;  %s521_s12 = sphi %s544_s12, %s13_s12  }
   0x2   : > { %p145_p1 = scmp.lt.s32.totalorder %s521_s12, 5 }
   0x4   : > { %p146_p2 = pnand %p446_p0, %p145_p1 }
   0x5   : > { %p172_p3 = scmp.lt.s32.totalorder (!%p146_p2), %s442_s13, 3  ;;  %v191_v0 = vld [vmem:[%s583_s2] sm:$0xff] (!%p146_p2)  ;;  %vm193_vm0 = vcmask (!%p146_p2), 228352   ;;  %vm200_vm1 = vcmask (!%p146_p2), 1043456   ;;  %vm523_vm2 = vmmov (!%p146_p2), 1   ;;  %v280_v8 = vlaneseq (!%p146_p2) }
   0x6   : > { %149 = sbr.rel (%p146_p2) target bundleno = 464 (0x1d0), region = 32  ;;  %480 = vmatprep.mubr.msk.f32.mxu0 (!%p146_p2), %vm193_vm0, %v191_v0  ;;  %vm495_vm3 = vmpackc.low (!%p146_p2), %vm200_vm1, %vm523_vm2  ;;  %v192_v7 = vld [vmem:[%s583_s2 + $0x8] sm:$0x3f] (!%p146_p2)  ;;  %vm376_vm5 = vcmask (!%p146_p2), 111616   ;;  %vm374_vm6 = vcmask (!%p146_p2), 113664  }
   0x7   : > { %v281_v9 = vshrl.u32 (!%p146_p2), %v280_v8, 7  ;;  %vm501_vm4 = vmpackc.low (!%p146_p2), %vm193_vm0, %vm193_vm0 }
   0x9   : > { %v282_v12 = vsub.s32 (!%p146_p2), 0, %v281_v9 }
   0xd   : > { %s586_s13 = smov (!%p172_p3, %s442_s13), 3 }
   0xe   : > { %s460_s16 = sshll.u32 %s586_s13, 5  ;;  %s179_s24 = scalar_lea.vmem %s582_s1, %s586_s13 }
   0xf   : > { %s176_s19 = scalar_lea.vmem %s581_s0, %s460_s16  ;;  %v189_v10 = vld [vmem:[%s179_s24] sm:$0x1]  ;;  %s461_s25 = sshll.u32 %s586_s13, 4 }
  0x10   : > { %v185_v1 = vld [vmem:[%s176_s19] sm:$0xff]  ;;  %v186_v2 = vld [vmem:[%s176_s19 + $0x8] sm:$0xff]  ;;  %v187_v3 = vld [vmem:[%s176_s19 + $0x10] sm:$0xff]  ;;  %v190_v11 = vmax.f32 %v189_v10, 0.0001  ;;  %s184_s28 = scalar_lea.vmem %s584_s3, %s461_s25 }
  0x11   : > { %v490_v4 = vpack.c.bf16 %v186_v2, %v185_v1  ;;  %v188_v5 = vld [vmem:[%s176_s19 + $0x18] sm:$0xf] }
  0x12   : > { %v494_v6 = vpack.c.bf16 %v188_v5, %v187_v3  ;;  %v283_v13 = vrot.slane %v190_v11, %v282_v12 }
  0x13   : > { %491 = vmatprep.subr.bf16.mxu0 %v490_v4 }
  0x14   : > { %493 = vmatpush3.bf16.msra.mxu0 %v490_v4 }
  0x15   : > { %496 = vmatprep.subr.msk.bf16.mxu0 %vm495_vm3, %v494_v6 }
  0x18   : > { %499 = vmatpush3.bf16.msk.msra.mxu0 %vm495_vm3, %v494_v6 }
  0x1b   : > { %481 = vmatmul.mubr.msk.f32.vlgmr.msra.gmra.mrb[0].mxu0 %vm193_vm0, %v192_v7 }
  0xee   : > { %v482_v14 = vpop.f32.mrb[0].mxu0 }
  0xef   : > { %v270_v15 = vpop.f32.mrb[1].mxu0  ;;  %v286_v18 = vmul.f32 %v482_v14, %v283_v13 }
  0xf0   : > { %v285_v16 = vmul.f32 %v283_v13, %v270_v15  ;;  %v500_v17 = vpack.c.bf16 %v482_v14, %v270_v15 }
  0xf2   : > { %502 = vmatprep.subr.msk.bf16.mxu1 %vm501_vm4, %v500_v17  ;;  %487 = vmatprep.mubr.msk.f32.mxu1 %vm193_vm0, %v285_v16 }
  0xf3   : > { %505 = vmatpush3.bf16.xpose.msk.msra.mxu1 %vm501_vm4, %v500_v17 }
  0xfa   : > { %488 = vmatmul.mubr.msk.f32.vlgmr.msra.gmra.mrb[0].mxu1 %vm193_vm0, %v286_v18 }
 0x1cd   : > { %v489_v19 = vpop.f32.mrb[0].mxu1 }
 0x1ce   : > { %377 = vst.msk [vmem:[%s184_s28 + $0x8] sm:$0x3f] %vm376_vm5, %v489_v19  ;;  %v365_v20 = vpop.f32.mrb[1].mxu1 }
 0x1cf   : > { %375 = vst.msk [vmem:[%s184_s28] sm:$0xff] %vm374_vm6, %v365_v20 }
 0x1d0 PF: > { %s13_s12 = sadd.s32 1, %s521_s12  }
 0x1d1   : > { %p10_p4 = scmp.ge.s32.totalorder %s13_s12, 6  }
 0x1d3   :  { %12 = sbr.rel (!%p10_p4) target bundleno = 1 (0x1), region = 65 }

// kernel: _lambda_.5
= control target key start
LH: loop header
LB: loop body
LE: loop exit
PB: predicated region body
PF: predicated region fallthrough
CT: control target
= control target key end

     0   :  { %s474_s12 = smov 0   ;;  %s517_s0 = inlined_call_operand.vmem [shape: f32[4,1,14,14], index: 0, kind: input, shape index: {}]   ;;  %s518_s1 = inlined_call_operand.vmem [shape: f32[4,1,1,14], index: 1, kind: input, shape index: {}]   ;;  %s519_s2 = inlined_call_operand.vmem [shape: f32[2,1,14,14], index: 2, kind: input, shape index: {}]   ;;  %s520_s3 = inlined_call_operand.vmem [shape: f32[4,2,1], index: 3, kind: output, shape index: {}]  }
   0x1 LB: > { %s404_s13 = sadd.s32 4294967295, %s452_s12   ;;  %p408_p0 = scmp.ge.s32.totalorder %s452_s12, 1  ;;  %s452_s12 = sphi %s474_s12, %s13_s12  }
   0x2   : > { %p145_p1 = scmp.lt.s32.totalorder %s452_s12, 5 }
   0x4   : > { %p146_p2 = pnand %p408_p0, %p145_p1 }
   0x5   : > { %p171_p3 = scmp.lt.s32.totalorder (!%p146_p2), %s404_s13, 3  ;;  %vm201_vm0 = vcmask (!%p146_p2), 113664   ;;  %v194_v5 = vlaneseq (!%p146_p2)  ;;  %v183_v13 = vld [vmem:[%s519_s2] sm:$0xff] (!%p146_p2)  ;;  %v185_v14 = vld [vmem:[%s519_s2 + $0x10] sm:$0xff] (!%p146_p2)  ;;  %v184_v16 = vld [vmem:[%s519_s2 + $0x8] sm:$0x3f] (!%p146_p2) }
   0x6   : > { %149 = sbr.rel (%p146_p2) target bundleno = 546 (0x222), region = 32  ;;  %vm431_vm1 = vmpackc.low (!%p146_p2), %vm201_vm0, %vm201_vm0  ;;  %v186_v17 = vld [vmem:[%s519_s2 + $0x18] sm:$0x3f] (!%p146_p2)  ;;  %vm296_vm2 = vcmask (!%p146_p2), 111616   ;;  %vm321_vm3 = vcmask (!%p146_p2), 130112   ;;  %vm332_vm4 = vcmask (!%p146_p2), 1041409  }
   0x7   : > { %v195_v6 = vshrl.u32 (!%p146_p2), %v194_v5, 7  ;;  %v311_v27 = vand.u32 (!%p146_p2), 127, %v194_v5  ;;  %vm335_vm5 = vcmask (!%p146_p2), 107520   ;;  %vm340_vm6 = vcmask (!%p146_p2), 1024  }
   0x9   : > { %v196_v7 = vsub.s32 (!%p146_p2), 0, %v195_v6  ;;  %v316_v28 = vadd.s32 (!%p146_p2), 4294967288, %v311_v27  ;;  %v314_v31 = vsub.s32 (!%p146_p2), %v311_v27, %v195_v6 }
   0xb   : > { %v319_v32 = vsub.s32 (!%p146_p2), %v316_v28, %v195_v6 }
   0xd   : > { %s522_s13 = smov (!%p171_p3, %s404_s13), 3 }
   0xe   : > { %s418_s14 = sshll.u32 %s522_s13, 4  ;;  %s178_s17 = scalar_lea.vmem %s518_s1, %s522_s13 }
   0xf   : > { %s175_s20 = scalar_lea.vmem %s517_s0, %s418_s14  ;;  %v189_v0 = vld [vmem:[%s178_s17] sm:$0x1]  ;;  %s411_s29 = sshll.u32 %s522_s13, 1 }
  0x10   : > { %v187_v1 = vld [vmem:[%s175_s20] sm:$0xff]  ;;  %v188_v2 = vld [vmem:[%s175_s20 + $0x8] sm:$0x3f]  ;;  %v190_v3 = vmax.f32 %v189_v0, 0.0001  ;;  %s182_s5 = scalar_lea.vmem %s520_s3, %s411_s29 }
  0x11   : > { %v430_v4 = vpack.c.bf16 %v188_v2, %v187_v1 }
  0x12   : > { %444 = vlog2.f32 %v190_v3 }
  0x13   : > { %432 = vmatprep.subr.msk.bf16.mxu0 %vm431_vm1, %v430_v4 }
  0x14   : > { %435 = vmatpush3.bf16.xpose.msk.msra.mxu0 %vm431_vm1, %v430_v4 }
  0x1c   : > { %v445_v8 = vpop.eup %444 }
  0x1d   : > { %v192_v9 = vmul.f32 0.6931472, %v445_v8 }
  0x1f   : > { %v197_v10 = vrot.slane %v192_v9, %v196_v7 }
  0x21   : > { %v200_v11 = vmul.f32 %v197_v10, %v188_v2  ;;  %v199_v12 = vmul.f32 %v197_v10, %v187_v1 }
  0x23   : > { %427 = vmatprep.mubr.msk.f32.mxu0 %vm201_vm0, %v199_v12 }
  0x24   : > { %428 = vmatmul.mubr.msk.f32.vlgmr.msra.gmra.mrb[0].mxu0 %vm201_vm0, %v200_v11 }
  0xf7   : > { %v429_v15 = vpop.f32.mrb[0].mxu0 }
  0xf8   : > { %v280_v18 = vpop.f32.mrb[1].mxu0  ;;  %v290_v21 = vmul.f32 %v429_v15, %v184_v16  ;;  %v292_v22 = vmul.f32 %v429_v15, %v186_v17 }
  0xf9   : > { %v289_v19 = vmul.f32 %v280_v18, %v183_v13  ;;  %v291_v20 = vmul.f32 %v280_v18, %v185_v14 }
  0xfa   : > { %v303_v25 = vsel %vm296_vm2, %v292_v22, 0.0  ;;  %v297_v26 = vsel %vm296_vm2, %v290_v21, 0.0 }
  0xfb   : > { %v300_v23 = vsel %vm201_vm0, %v291_v20, 0.0  ;;  %v293_v24 = vsel %vm201_vm0, %v289_v19, 0.0 }
  0xfc   : > { %301 = vadd.xlane.f32.xlu1 %v300_v23  ;;  %294 = vadd.xlane.f32.xlu0 %v293_v24 }
 0x100   : > { %304 = vadd.xlane.f32.xlu1 %v303_v25  ;;  %298 = vadd.xlane.f32.xlu0 %v297_v26 }
 0x189   : > { %v302_v29 = vpop.xlane.xlu1 %301  ;;  %v295_v30 = vpop.xlane.xlu0 %294 }
 0x18a   : > { %v326_v35 = vrot.slane %v302_v29, %v314_v31  ;;  %v315_v36 = vrot.slane %v295_v30, %v314_v31 }
 0x18d   : > { %v305_v33 = vpop.xlane.xlu1 %304  ;;  %v299_v34 = vpop.xlane.xlu0 %298 }
 0x18e   : > { %v330_v37 = vrot.slane %v305_v33, %v319_v32  ;;  %v320_v38 = vrot.slane %v299_v34, %v319_v32 }
 0x190   : > { %v322_v39 = vsel %vm321_vm3, %v320_v38, %v315_v36  ;;  %v331_v40 = vsel %vm321_vm3, %v330_v37, %v326_v35 }
 0x191   : > { %v333_v41 = vsel %vm332_vm4, %v331_v40, %v322_v39 }
 0x192   : > { %v336_v42 = vsel %vm335_vm5, %v333_v41, 0.0 }
 0x193   : > { %337 = vadd.xlane.f32.xlu0 %v336_v42 }
 0x220   : > { %v338_v43 = vpop.xlane.xlu0 %337 }
 0x221   : > { %341 = vst.msk [vmem:[%s182_s5] sm:$0x3] %vm340_vm6, %v338_v43 }
 0x222 PF: > { %s13_s12 = sadd.s32 1, %s452_s12  }
 0x223   : > { %p10_p4 = scmp.ge.s32.totalorder %s13_s12, 6  }
 0x225   :  { %12 = sbr.rel (!%p10_p4) target bundleno = 1 (0x1), region = 65 }

</bundles_post_ra>
